<compile_context>
chip_gen: v7x
topology: tpu7x:2x2x1
jax: 0.10.0
libtpu: 0.0.40
codegen_flags: <defaults>
</compile_context>

<pallas_src>
import jax
import jax.numpy as jnp
from jax.experimental import pallas as pl
from jax.experimental.pallas import tpu as pltpu

LANES = 128  # vreg lane width — pad small feature dims up to this


def _sigmoid(z):
    # exp -> EUP slot; exact reciprocal (kernel is HBM-bound, divide is off the critical path)
    return pl.reciprocal(1.0 + jnp.exp(-z))


def _mlp_kernel(x_ref, w1_ref, b1_ref, w2_ref, b2_ref, o_ref):
    # fc1: (tm, 400) bf16 @ (400, 128) bf16 -> f32 accumulate on the MXU
    h = jnp.dot(x_ref[...], w1_ref[...], preferred_element_type=jnp.float32)
    h = _sigmoid(h + b1_ref[...])                       # f32 elementwise (v5e-safe)
    # fc2: cast activations to bf16 for full-rate MXU input, accumulate in f32
    y = jnp.dot(h.astype(w2_ref.dtype), w2_ref[...],
                preferred_element_type=jnp.float32)
    o_ref[...] = _sigmoid(y + b2_ref[...]).astype(o_ref.dtype)


def _round_up(n, m):
    return ((n + m - 1) // m) * m


def net_forward(x, w1, b1, w2, b2, *, tm_max=4096):
    """Pallas forward of Net: sigmoid(fc2(sigmoid(fc1(x)))).

    x: (B, 400) f32; w1: (400, 25); b1: (1, 25); w2: (25, 10); b2: (1, 10).
    Returns (B, 10) f32.
    """
    B, K = x.shape
    n_hidden = w1.shape[1]
    n_out = w2.shape[1]
    H = LANES

    # --- wrapper-side padding / dtype prep (padded cols/rows are zeros) ---------------
    cdt = jnp.bfloat16
    w1p = jnp.zeros((K, H), cdt).at[:, :n_hidden].set(w1.astype(cdt))
    b1p = jnp.zeros((1, H), jnp.float32).at[:, :n_hidden].set(b1.astype(jnp.float32))
    w2p = jnp.zeros((H, H), cdt).at[:n_hidden, :n_out].set(w2.astype(cdt))
    b2p = jnp.zeros((1, H), jnp.float32).at[:, :n_out].set(b2.astype(jnp.float32))

    # Batch tile: multiple of 256 rows, capped for v7x's smaller scoped VMEM.
    tm = min(tm_max, _round_up(B, 256))
    B_pad = _round_up(B, tm)
    xb = x.astype(cdt)
    if B_pad != B:
        xb = jnp.pad(xb, ((0, B_pad - B), (0, 0)))
    grid = (B_pad // tm,)

    const = lambda i: (0, 0)
    cost = pl.CostEstimate(
        flops=2 * B_pad * (K * H + H * H),
        transcendentals=2 * B_pad * H,
        bytes_accessed=(B_pad * K * 2            # x reads (bf16)
                        + (K * H + H * H) * 2    # weights (bf16)
                        + 2 * H * 4              # biases (f32)
                        + B_pad * H * 4),        # output writes (f32)
    )

    out = pl.pallas_call(
        _mlp_kernel,
        out_shape=jax.ShapeDtypeStruct((B_pad, H), jnp.float32),
        grid=grid,
        in_specs=[
            pl.BlockSpec((tm, K), lambda i: (i, 0)),   # x tile — pipelined over the grid
            pl.BlockSpec((K, H), const),               # fc1 weight — VMEM-resident
            pl.BlockSpec((1, H), const),               # fc1 bias
            pl.BlockSpec((H, H), const),               # fc2 weight
            pl.BlockSpec((1, H), const),               # fc2 bias
        ],
        out_specs=pl.BlockSpec((tm, H), lambda i: (i, 0)),
        compiler_params=pltpu.CompilerParams(
            dimension_semantics=("parallel",)),        # shard batch axis across v7x's 2 TCs
        cost_estimate=cost,
    )(xb, w1p, b1p, w2p, b2p)

    # Drop padded batch rows and padded output lanes.
    return out[:B, :n_out]


def init_params(key):
    """Deterministic init matching PyTorch nn.Linear default: U(-1/sqrt(fan_in), 1/sqrt(fan_in))."""
    k1, k2, k3, k4 = jax.random.split(key, 4)
    in1, out1 = 400, 25
    in2, out2 = 25, 10
    bound1 = 1.0 / jnp.sqrt(in1)
    bound2 = 1.0 / jnp.sqrt(in2)
    w1 = jax.random.uniform(k1, (in1, out1), jnp.float32, -bound1, bound1)
    b1 = jax.random.uniform(k2, (1, out1), jnp.float32, -bound1, bound1)
    w2 = jax.random.uniform(k3, (in2, out2), jnp.float32, -bound2, bound2)
    b2 = jax.random.uniform(k4, (1, out2), jnp.float32, -bound2, bound2)
    return w1, b1, w2, b2


if __name__ == "__main__":
    key = jax.random.PRNGKey(0)
    k_params, k_x = jax.random.split(key)
    w1, b1, w2, b2 = init_params(k_params)

    B = 8
    x = jax.random.normal(k_x, (B, 400), jnp.float32)

    out = jax.block_until_ready(net_forward(x, w1, b1, w2, b2))
    assert out.shape == (B, 10)

    # Strict check vs a reference that applies the same bf16 input quantization / f32 accumulation.
    f32 = jnp.float32
    xq = x.astype(jnp.bfloat16).astype(f32)
    w1q = w1.astype(jnp.bfloat16).astype(f32)
    w2q = w2.astype(jnp.bfloat16).astype(f32)
    h = jax.nn.sigmoid(xq @ w1q + b1)
    ref_bf16 = jax.nn.sigmoid(h.astype(jnp.bfloat16).astype(f32) @ w2q + b2)
    assert jnp.allclose(out, ref_bf16, atol=1e-3), "mismatch vs bf16-faithful reference"

    # Loose check vs the pure-f32 PyTorch-equivalent reference (bf16 inputs cost a little accuracy).
    ref_f32 = jax.nn.sigmoid(jax.nn.sigmoid(x @ w1 + b1) @ w2 + b2)
    assert jnp.allclose(out, ref_f32, atol=5e-2), "mismatch vs f32 reference"

    print("KERNEL_OK")
</pallas_src>

<mosaic_0001>
module attributes {stable_mosaic.version = 11 : i64} {
  func.func @_mlp_kernel(%arg0: i32, %arg1: memref<256x400xbf16, #tpu.memory_space<vmem>>, %arg2: memref<400x128xbf16, #tpu.memory_space<vmem>>, %arg3: memref<1x128xf32, #tpu.memory_space<vmem>>, %arg4: memref<128x128xbf16, #tpu.memory_space<vmem>>, %arg5: memref<1x128xf32, #tpu.memory_space<vmem>>, %arg6: memref<256x128xf32, #tpu.memory_space<vmem>>) attributes {dimension_semantics = [#tpu.dimension_semantics<parallel>], iteration_bounds = array<i64: 1>, scalar_prefetch = 0 : i64, scratch_operands = 0 : i64, tpu.core_type = #tpu.core_type<tc>, window_params = [{transform_indices = @transform_0, window_bounds = array<i64: 256, 400>}, {pipeline_mode = #tpu.pipeline_mode<synchronous>, transform_indices = @transform_1, window_bounds = array<i64: 400, 128>}, {pipeline_mode = #tpu.pipeline_mode<synchronous>, transform_indices = @transform_2, window_bounds = array<i64: 1, 128>}, {pipeline_mode = #tpu.pipeline_mode<synchronous>, transform_indices = @transform_3, window_bounds = array<i64: 128, 128>}, {pipeline_mode = #tpu.pipeline_mode<synchronous>, transform_indices = @transform_4, window_bounds = array<i64: 1, 128>}, {transform_indices = @transform_5, window_bounds = array<i64: 256, 128>}]} {
    %c0 = arith.constant 0 : index
    %c0_0 = arith.constant 0 : index
    %0 = vector.load %arg1[%c0, %c0_0] : memref<256x400xbf16, #tpu.memory_space<vmem>>, vector<256x400xbf16>
    %c0_1 = arith.constant 0 : index
    %c0_2 = arith.constant 0 : index
    %1 = vector.load %arg2[%c0_1, %c0_2] : memref<400x128xbf16, #tpu.memory_space<vmem>>, vector<400x128xbf16>
    %cst = arith.constant dense<0.000000e+00> : vector<256x128xf32>
    %2 = tpu.matmul %0, %1, %cst {dimension_numbers = #tpu.dot_dimension_numbers<[1], [0], [0], [1], [0, 0, 1, 1], [], []>} : vector<256x400xbf16>, vector<400x128xbf16>, vector<256x128xf32> -> vector<256x128xf32>
    %c0_3 = arith.constant 0 : index
    %c0_4 = arith.constant 0 : index
    %3 = vector.load %arg3[%c0_3, %c0_4] : memref<1x128xf32, #tpu.memory_space<vmem>>, vector<1x128xf32>
    %4 = vector.broadcast %3 : vector<1x128xf32> to vector<256x128xf32>
    %5 = arith.addf %2, %4 : vector<256x128xf32>
    %cst_5 = arith.constant 0.000000e+00 : f32
    %6 = vector.broadcast %cst_5 : f32 to vector<256x128xf32>
    %7 = arith.subf %6, %5 : vector<256x128xf32>
    %8 = math.exp %7 : vector<256x128xf32>
    %cst_6 = arith.constant 1.000000e+00 : f32
    %9 = vector.broadcast %cst_6 : f32 to vector<256x128xf32>
    %10 = arith.addf %9, %8 : vector<256x128xf32>
    %11 = tpu.reciprocal %10 : vector<256x128xf32> -> vector<256x128xf32>
    %12 = arith.truncf %11 : vector<256x128xf32> to vector<256x128xbf16>
    %c0_7 = arith.constant 0 : index
    %c0_8 = arith.constant 0 : index
    %13 = vector.load %arg4[%c0_7, %c0_8] : memref<128x128xbf16, #tpu.memory_space<vmem>>, vector<128x128xbf16>
    %cst_9 = arith.constant dense<0.000000e+00> : vector<256x128xf32>
    %14 = tpu.matmul %12, %13, %cst_9 {dimension_numbers = #tpu.dot_dimension_numbers<[1], [0], [0], [1], [0, 0, 1, 1], [], []>} : vector<256x128xbf16>, vector<128x128xbf16>, vector<256x128xf32> -> vector<256x128xf32>
    %c0_10 = arith.constant 0 : index
    %c0_11 = arith.constant 0 : index
    %15 = vector.load %arg5[%c0_10, %c0_11] : memref<1x128xf32, #tpu.memory_space<vmem>>, vector<1x128xf32>
    %16 = vector.broadcast %15 : vector<1x128xf32> to vector<256x128xf32>
    %17 = arith.addf %14, %16 : vector<256x128xf32>
    %cst_12 = arith.constant 0.000000e+00 : f32
    %18 = vector.broadcast %cst_12 : f32 to vector<256x128xf32>
    %19 = arith.subf %18, %17 : vector<256x128xf32>
    %20 = math.exp %19 : vector<256x128xf32>
    %cst_13 = arith.constant 1.000000e+00 : f32
    %21 = vector.broadcast %cst_13 : f32 to vector<256x128xf32>
    %22 = arith.addf %21, %20 : vector<256x128xf32>
    %23 = tpu.reciprocal %22 : vector<256x128xf32> -> vector<256x128xf32>
    %c0_14 = arith.constant 0 : index
    %c0_15 = arith.constant 0 : index
    %24 = vector.load %arg6[%c0_14, %c0_15] : memref<256x128xf32, #tpu.memory_space<vmem>>, vector<256x128xf32>
    tpu.vector_store %arg6[%c0_14, %c0_15], %23 {strides = array<i32>} : memref<256x128xf32, #tpu.memory_space<vmem>>, vector<256x128xf32>,
    return
  }
  func.func @transform_0(%arg0: i32) -> (i32, i32) {
    %c0_i32 = arith.constant 0 : i32
    %c0_i32_0 = arith.constant 0 : i32
    return %arg0, %c0_i32 : i32, i32
  }
  func.func @transform_1(%arg0: i32) -> (i32, i32) {
    %c0_i32 = arith.constant 0 : i32
    %c0_i32_0 = arith.constant 0 : i32
    %c0_i32_1 = arith.constant 0 : i32
    return %c0_i32, %c0_i32_0 : i32, i32
  }
  func.func @transform_2(%arg0: i32) -> (i32, i32) {
    %c0_i32 = arith.constant 0 : i32
    %c0_i32_0 = arith.constant 0 : i32
    %c0_i32_1 = arith.constant 0 : i32
    return %c0_i32, %c0_i32_0 : i32, i32
  }
  func.func @transform_3(%arg0: i32) -> (i32, i32) {
    %c0_i32 = arith.constant 0 : i32
    %c0_i32_0 = arith.constant 0 : i32
    %c0_i32_1 = arith.constant 0 : i32
    return %c0_i32, %c0_i32_0 : i32, i32
  }
  func.func @transform_4(%arg0: i32) -> (i32, i32) {
    %c0_i32 = arith.constant 0 : i32
    %c0_i32_0 = arith.constant 0 : i32
    %c0_i32_1 = arith.constant 0 : i32
    return %c0_i32, %c0_i32_0 : i32, i32
  }
  func.func @transform_5(%arg0: i32) -> (i32, i32) {
    %c0_i32 = arith.constant 0 : i32
    %c0_i32_0 = arith.constant 0 : i32
    return %arg0, %c0_i32 : i32, i32
  }
}

</mosaic_0001>

<bundles_post_ra>
// kernel: tpu_custom_call.1
= control target key start
LH: loop header
LB: loop body
LE: loop exit
PB: predicated region body
PF: predicated region fallthrough
CT: control target
= control target key end

     0   :  { %v2312_v1 = vmov 0   ;;  %vm597_vm0 = vcmask 130048   ;;  %s2739_s0 = inlined_call_operand.vmem [shape: bf16[256,400], index: 0, kind: input, shape index: {}]   ;;  %s2740_s1 = inlined_call_operand.vmem [shape: bf16[400,128], index: 1, kind: input, shape index: {}]   ;;  %s2741_s2 = inlined_call_operand.vmem [shape: f32[1,128], index: 2, kind: input, shape index: {}]   ;;  %s2742_s3 = inlined_call_operand.vmem [shape: bf16[128,128], index: 3, kind: input, shape index: {}]   ;;  %s2743_s4 = inlined_call_operand.vmem [shape: f32[1,128], index: 4, kind: input, shape index: {}]   ;;  %s2744_s5 = inlined_call_operand.hbm [shape: f32[256,128], index: 5, kind: output, shape index: {}]  }
   0x1   :  { %v1903_v0 = vld [vmem:[%s2740_s1 + $0x40] sm:$0xff]   ;;  %807 = vmatprep.subr.bf16.mxu1 %v2312_v1  ;;  %v1906_v4 = vld [vmem:[%s2740_s1 + $0x48] sm:$0xff]   ;;  %v1909_v7 = vld [vmem:[%s2740_s1 + $0x50] sm:$0xff]  }
   0x2   :  { %v1904_v2 = vld [vmem:[%s2740_s1 + $0x80] sm:$0xff]   ;;  %1699 = vmatprep.subr.bf16.mxu0 %v1903_v0  ;;  %v1907_v5 = vld [vmem:[%s2740_s1 + $0x88] sm:$0xff]   ;;  %v1910_v8 = vld [vmem:[%s2740_s1 + $0x90] sm:$0xff]  }
   0x3   :  { %v1905_v3 = vld [vmem:[%s2740_s1] sm:$0xff]   ;;  %808 = vmatpush1.bf16.msra.mxu1 %v1904_v2  ;;  %v1908_v6 = vld [vmem:[%s2740_s1 + $0x8] sm:$0xff]   ;;  %v1911_v9 = vld [vmem:[%s2740_s1 + $0x10] sm:$0xff]  }
   0x4   :  { %1700 = vmatpush3.bf16.msra.mxu0 %v1905_v3  ;;  %809 = vmatprep.subr.bf16.mxu1 %v2312_v1  ;;  %v1912_v10 = vld [vmem:[%s2740_s1 + $0x58] sm:$0xff]   ;;  %v1915_v13 = vld [vmem:[%s2740_s1 + $0x60] sm:$0xff]   ;;  %v1918_v16 = vld [vmem:[%s2740_s1 + $0x68] sm:$0xff]  }
   0x5   :  { %1701 = vmatprep.subr.bf16.mxu0 %v1906_v4  ;;  %v1913_v11 = vld [vmem:[%s2740_s1 + $0x98] sm:$0xff]   ;;  %v1916_v14 = vld [vmem:[%s2740_s1 + $0xa0] sm:$0xff]   ;;  %v1919_v17 = vld [vmem:[%s2740_s1 + $0xa8] sm:$0xff]  }
   0x6   :  { %v1914_v12 = vld [vmem:[%s2740_s1 + $0x18] sm:$0xff]   ;;  %v1917_v15 = vld [vmem:[%s2740_s1 + $0x20] sm:$0xff]   ;;  %v1920_v18 = vld [vmem:[%s2740_s1 + $0x28] sm:$0xff]  }
   0x7   :  { %810 = vmatpush1.bf16.msra.mxu1 %v1907_v5  ;;  %v1921_v19 = vld [vmem:[%s2740_s1 + $0x70] sm:$0xff]   ;;  %v1924_v22 = vld [vmem:[%s2740_s1 + $0x78] sm:$0xff]   ;;  %v1930_v28 = vld [vmem:[%s2740_s1 + $0xc0] sm:$0xff]  }
   0x8   :  { %1702 = vmatpush3.bf16.msra.mxu0 %v1908_v6  ;;  %811 = vmatprep.subr.bf16.mxu1 %v2312_v1  ;;  %v1922_v20 = vld [vmem:[%s2740_s1 + $0xb0] sm:$0xff]   ;;  %v1925_v24 = vld [vmem:[%s2740_s1 + $0xb8] sm:$0xff]   ;;  %v2024_v48 = vld [vmem:[%s2742_s3] sm:$0xff]  }
   0x9   :  { %1703 = vmatprep.subr.bf16.mxu0 %v1909_v7  ;;  %v1923_v21 = vld [vmem:[%s2740_s1 + $0x30] sm:$0xff]   ;;  %v1933_v25 = vld [vmem:[%s2739_s0 + $0xc] ss:$16 sps:$4 sm:$0xff]   ;;  %v1931_v30 = vld [vmem:[%s2739_s0 + $0x8] ss:$16 sps:$4 sm:$0xff]  }
   0xa   :  { %v1929_v23 = vld [vmem:[%s2739_s0 + $0x4] ss:$16 sps:$4 sm:$0xff]   ;;  %v1926_v26 = vld [vmem:[%s2740_s1 + $0x38] sm:$0xff]   ;;  %1674 = vmatprep.mubr.msk.bf16.mxu1 %vm597_vm0, %v1933_v25  ;;  %v1927_v27 = vld [vmem:[%s2739_s0] ss:$16 sps:$4 sm:$0xff]  }
   0xb   :  { %812 = vmatpush1.bf16.msra.mxu1 %v1910_v8  ;;  %678 = vmatprep.mubr.bf16.mxu0 %v1929_v23  ;;  %v1934_v29 = vld [vmem:[%s2739_s0 + $0x24] ss:$16 sps:$4 sm:$0xff]   ;;  %v1937_v31 = vld [vmem:[%s2739_s0 + $0x2c] ss:$16 sps:$4 sm:$0xff]   ;;  %v1936_v32 = vld [vmem:[%s2739_s0 + $0x20] ss:$16 sps:$4 sm:$0xff]  }
   0xc   :  { %1704 = vmatpush3.bf16.msra.mxu0 %v1911_v9  ;;  %813 = vmatprep.subr.bf16.mxu1 %v2312_v1  ;;  %v1940_v33 = vld [vmem:[%s2739_s0 + $0x44] ss:$16 sps:$4 sm:$0xff]   ;;  %v1939_v34 = vld [vmem:[%s2739_s0 + $0x28] ss:$16 sps:$4 sm:$0xff]   ;;  %v1943_v35 = vld [vmem:[%s2739_s0 + $0x4c] ss:$16 sps:$4 sm:$0xff]  }
   0xd   :  { %1705 = vmatprep.subr.bf16.mxu0 %v1912_v10  ;;  %v1942_v36 = vld [vmem:[%s2739_s0 + $0x40] ss:$16 sps:$4 sm:$0xff]   ;;  %v1946_v37 = vld [vmem:[%s2739_s0 + $0x64] ss:$16 sps:$4 sm:$0xff]   ;;  %v1945_v38 = vld [vmem:[%s2739_s0 + $0x48] ss:$16 sps:$4 sm:$0xff]  }
   0xe   :  { %v1949_v39 = vld [vmem:[%s2739_s0 + $0x6c] ss:$16 sps:$4 sm:$0xff]   ;;  %v1948_v40 = vld [vmem:[%s2739_s0 + $0x60] ss:$16 sps:$4 sm:$0xff]   ;;  %v1952_v41 = vld [vmem:[%s2739_s0 + $0x84] ss:$16 sps:$4 sm:$0xff]  }
   0xf   :  { %814 = vmatpush1.bf16.msra.mxu1 %v1913_v11  ;;  %v1951_v42 = vld [vmem:[%s2739_s0 + $0x68] ss:$16 sps:$4 sm:$0xff]   ;;  %v1955_v43 = vld [vmem:[%s2739_s0 + $0x8c] ss:$16 sps:$4 sm:$0xff]   ;;  %v1954_v44 = vld [vmem:[%s2739_s0 + $0x80] ss:$16 sps:$4 sm:$0xff]  }
  0x10   :  { %1706 = vmatpush3.bf16.msra.mxu0 %v1914_v12  ;;  %815 = vmatprep.subr.bf16.mxu1 %v2312_v1  ;;  %v1958_v45 = vld [vmem:[%s2739_s0 + $0xa4] ss:$16 sps:$4 sm:$0xff]   ;;  %v1957_v46 = vld [vmem:[%s2739_s0 + $0x88] ss:$16 sps:$4 sm:$0xff]   ;;  %v1961_v47 = vld [vmem:[%s2739_s0 + $0xac] ss:$16 sps:$4 sm:$0xff]  }
  0x11   :  { %1707 = vmatprep.subr.bf16.mxu0 %v1915_v13  ;;  %v1960_v49 = vld [vmem:[%s2739_s0 + $0xa0] ss:$16 sps:$4 sm:$0xff]   ;;  %v1964_v50 = vld [vmem:[%s2739_s0 + $0xc4] ss:$16 sps:$4 sm:$0xff]  }
  0x13   :  { %816 = vmatpush1.bf16.msra.mxu1 %v1916_v14 }
  0x14   :  { %1708 = vmatpush3.bf16.msra.mxu0 %v1917_v15  ;;  %817 = vmatprep.subr.bf16.mxu1 %v2312_v1 }
  0x15   :  { %1709 = vmatprep.subr.bf16.mxu0 %v1918_v16 }
  0x17   :  { %818 = vmatpush1.bf16.msra.mxu1 %v1919_v17 }
  0x18   :  { %1710 = vmatpush3.bf16.msra.mxu0 %v1920_v18  ;;  %819 = vmatprep.subr.bf16.mxu1 %v2312_v1 }
  0x19   :  { %1711 = vmatprep.subr.bf16.mxu0 %v1921_v19 }
  0x1b   :  { %820 = vmatpush1.bf16.msra.mxu1 %v1922_v20 }
  0x1c   :  { %1712 = vmatpush3.bf16.msra.mxu0 %v1923_v21  ;;  %821 = vmatprep.subr.bf16.mxu1 %v2312_v1 }
  0x1d   :  { %1713 = vmatprep.subr.bf16.mxu0 %v1924_v22 }
  0x1f   :  { %822 = vmatpush1.bf16.msra.mxu1 %v1925_v24 }
  0x20   :  { %1714 = vmatpush3.bf16.msra.mxu0 %v1926_v26  ;;  %823 = vmatprep.subr.bf16.mxu1 %v2312_v1 }
  0x21   :  { %1835 = vmatprep.subr.bf16.mxu0 %v2024_v48 }
  0x23   :  { %679 = vmatmul.mubr.bf16.vlgmr.msra.gmra.mrb[0].mxu0 %v1927_v27  ;;  %824 = vmatpush1.bf16.msra.mxu1 %v1930_v28 }
  0x24   :  { %686 = vmatprep.mubr.bf16.mxu0 %v1934_v29  ;;  %1836 = vmatpush3.bf16.msra.mxu0 %v2024_v48 }
  0x25   :  { %1883 = vmatprep.subr.bf16.mxu1 %v2024_v48 }
  0x26   :  { %840 = vmatmul.mubr.bf16.vlgmr.msra.gmra.mrb[0].mxu1 %v1931_v30 }
  0x27   :  { %1675 = vmatprep.mubr.msk.bf16.mxu1 %vm597_vm0, %v1937_v31  ;;  %1891 = vmatpush3.bf16.msra.mxu1 %v2024_v48 }
  0x2b   :  { %687 = vmatmul.mubr.bf16.gmra.mrb[4].mxu0 %v1936_v32 }
  0x2c   :  { %694 = vmatprep.mubr.bf16.mxu0 %v1940_v33 }
  0x2e   :  { %848 = vmatmul.mubr.bf16.gmra.mrb[4].mxu1 %v1939_v34 }
  0x2f   :  { %1676 = vmatprep.mubr.msk.bf16.mxu1 %vm597_vm0, %v1943_v35 }
  0x33   :  { %695 = vmatmul.mubr.bf16.gmra.mrb[8].mxu0 %v1942_v36 }
  0x34   :  { %702 = vmatprep.mubr.bf16.mxu0 %v1946_v37 }
  0x36   :  { %856 = vmatmul.mubr.bf16.gmra.mrb[8].mxu1 %v1945_v38 }
  0x37   :  { %1677 = vmatprep.mubr.msk.bf16.mxu1 %vm597_vm0, %v1949_v39 }
  0x3b   :  { %703 = vmatmul.mubr.bf16.gmra.mrb[12].mxu0 %v1948_v40 }
  0x3c   :  { %710 = vmatprep.mubr.bf16.mxu0 %v1952_v41 }
  0x3e   :  { %864 = vmatmul.mubr.bf16.gmra.mrb[12].mxu1 %v1951_v42 }
  0x3f   :  { %1678 = vmatprep.mubr.msk.bf16.mxu1 %vm597_vm0, %v1955_v43 }
  0x43   :  { %711 = vmatmul.mubr.bf16.gmra.mrb[16].mxu0 %v1954_v44 }
  0x44   :  { %718 = vmatprep.mubr.bf16.mxu0 %v1958_v45 }
  0x46   :  { %872 = vmatmul.mubr.bf16.gmra.mrb[16].mxu1 %v1957_v46 }
  0x47   :  { %1679 = vmatprep.mubr.msk.bf16.mxu1 %vm597_vm0, %v1961_v47 }
  0x48   :  { %10 = vsyncpa [#allocation3], 0  ;;  %v1963_v51 = vld [vmem:[%s2739_s0 + $0xa8] ss:$16 sps:$4 sm:$0xff]   ;;  %v1967_v52 = vld [vmem:[%s2739_s0 + $0xcc] ss:$16 sps:$4 sm:$0xff]  }
  0x49   :  { %v1966_v53 = vld [vmem:[%s2739_s0 + $0xc0] ss:$16 sps:$4 sm:$0xff]   ;;  %v1970_v54 = vld [vmem:[%s2739_s0 + $0xe4] ss:$16 sps:$4 sm:$0xff]   ;;  %v1969_v55 = vld [vmem:[%s2739_s0 + $0xc8] ss:$16 sps:$4 sm:$0xff]  }
  0x4a   :  { %v1973_v56 = vld [vmem:[%s2739_s0 + $0xec] ss:$16 sps:$4 sm:$0xff]   ;;  %v1972_v57 = vld [vmem:[%s2739_s0 + $0xe0] ss:$16 sps:$4 sm:$0xff]   ;;  %v1976_v58 = vld [vmem:[%s2739_s0 + $0x104] ss:$16 sps:$4 sm:$0xff]  }
  0x4b   :  { %719 = vmatmul.mubr.bf16.gmra.mrb[20].mxu0 %v1960_v49  ;;  %v1975_v59 = vld [vmem:[%s2739_s0 + $0xe8] ss:$16 sps:$4 sm:$0xff]   ;;  %v1979_v60 = vld [vmem:[%s2739_s0 + $0x10c] ss:$16 sps:$4 sm:$0xff]   ;;  %v1978_v61 = vld [vmem:[%s2739_s0 + $0x100] ss:$16 sps:$4 sm:$0xff]  }
  0x4c   :  { %726 = vmatprep.mubr.bf16.mxu0 %v1964_v50  ;;  %v1982_v62 = vld [vmem:[%s2739_s0 + $0x124] ss:$16 sps:$4 sm:$0xff]   ;;  %v1981_v63 = vld [vmem:[%s2739_s0 + $0x108] ss:$16 sps:$4 sm:$0xff]   ;;  %v1985_v0 = vld [vmem:[%s2739_s0 + $0x12c] ss:$16 sps:$4 sm:$0xff]  }
  0x4d   :  { %v1984_v1 = vld [vmem:[%s2739_s0 + $0x120] ss:$16 sps:$4 sm:$0xff]   ;;  %v1988_v2 = vld [vmem:[%s2739_s0 + $0x144] ss:$16 sps:$4 sm:$0xff]   ;;  %v1987_v3 = vld [vmem:[%s2739_s0 + $0x128] ss:$16 sps:$4 sm:$0xff]  }
  0x4e   :  { %880 = vmatmul.mubr.bf16.gmra.mrb[20].mxu1 %v1963_v51  ;;  %v1991_v4 = vld [vmem:[%s2739_s0 + $0x14c] ss:$16 sps:$4 sm:$0xff]   ;;  %v1990_v5 = vld [vmem:[%s2739_s0 + $0x140] ss:$16 sps:$4 sm:$0xff]   ;;  %v1994_v6 = vld [vmem:[%s2739_s0 + $0x164] ss:$16 sps:$4 sm:$0xff]  }
  0x4f   :  { %1680 = vmatprep.mubr.msk.bf16.mxu1 %vm597_vm0, %v1967_v52  ;;  %v1993_v7 = vld [vmem:[%s2739_s0 + $0x148] ss:$16 sps:$4 sm:$0xff]   ;;  %v1997_v8 = vld [vmem:[%s2739_s0 + $0x16c] ss:$16 sps:$4 sm:$0xff]   ;;  %v1996_v9 = vld [vmem:[%s2739_s0 + $0x160] ss:$16 sps:$4 sm:$0xff]  }
  0x50   :  { %v2000_v10 = vld [vmem:[%s2739_s0 + $0x184] ss:$16 sps:$4 sm:$0xff]   ;;  %v1999_v11 = vld [vmem:[%s2739_s0 + $0x168] ss:$16 sps:$4 sm:$0xff]   ;;  %v2003_v12 = vld [vmem:[%s2739_s0 + $0x18c] ss:$16 sps:$4 sm:$0xff]  }
  0x51   :  { %v2002_v13 = vld [vmem:[%s2739_s0 + $0x180] ss:$16 sps:$4 sm:$0xff]   ;;  %v2006_v14 = vld [vmem:[%s2739_s0 + $0x1a4] ss:$16 sps:$4 sm:$0xff]   ;;  %v2005_v15 = vld [vmem:[%s2739_s0 + $0x188] ss:$16 sps:$4 sm:$0xff]  }
  0x52   :  { %v2009_v16 = vld [vmem:[%s2739_s0 + $0x1ac] ss:$16 sps:$4 sm:$0xff]   ;;  %v2008_v17 = vld [vmem:[%s2739_s0 + $0x1a0] ss:$16 sps:$4 sm:$0xff]   ;;  %v2012_v18 = vld [vmem:[%s2739_s0 + $0x1c4] ss:$16 sps:$4 sm:$0xff]  }
  0x53   :  { %727 = vmatmul.mubr.bf16.gmra.mrb[24].mxu0 %v1966_v53  ;;  %v2025_v19 = vld [vmem:[%s2742_s3 + $0x8] sm:$0xff]   ;;  %v2026_v22 = vld [vmem:[%s2742_s3 + $0x10] sm:$0xff]   ;;  %v2027_v25 = vld [vmem:[%s2742_s3 + $0x18] sm:$0xff]  }
  0x54   :  { %734 = vmatprep.mubr.bf16.mxu0 %v1970_v54  ;;  %v2011_v20 = vld [vmem:[%s2739_s0 + $0x1a8] ss:$16 sps:$4 sm:$0xff]   ;;  %1837 = vmatprep.subr.bf16.mxu0 %v2025_v19  ;;  %v2015_v21 = vld [vmem:[%s2739_s0 + $0x1cc] ss:$16 sps:$4 sm:$0xff]   ;;  %v2014_v23 = vld [vmem:[%s2739_s0 + $0x1c0] ss:$16 sps:$4 sm:$0xff]  }
  0x55   :  { %1884 = vmatprep.subr.bf16.mxu1 %v2025_v19  ;;  %1838 = vmatpush3.bf16.msra.mxu0 %v2025_v19  ;;  %v2018_v24 = vld [vmem:[%s2739_s0 + $0x1e4] ss:$16 sps:$4 sm:$0xff]   ;;  %v2017_v26 = vld [vmem:[%s2739_s0 + $0x1c8] ss:$16 sps:$4 sm:$0xff]   ;;  %v2021_v27 = vld [vmem:[%s2739_s0 + $0x1ec] ss:$16 sps:$4 sm:$0xff]  }
  0x56   :  { %888 = vmatmul.mubr.bf16.gmra.mrb[24].mxu1 %v1969_v55  ;;  %1839 = vmatprep.subr.bf16.mxu0 %v2026_v22  ;;  %v2028_v28 = vld [vmem:[%s2742_s3 + $0x20] sm:$0xff]   ;;  %v2029_v30 = vld [vmem:[%s2742_s3 + $0x28] sm:$0xff]   ;;  %v2030_v32 = vld [vmem:[%s2742_s3 + $0x30] sm:$0xff]  }
  0x57   :  { %1681 = vmatprep.mubr.msk.bf16.mxu1 %vm597_vm0, %v1973_v56  ;;  %1892 = vmatpush3.bf16.msra.mxu1 %v2025_v19  ;;  %v2020_v29 = vld [vmem:[%s2739_s0 + $0x1e0] ss:$16 sps:$4 sm:$0xff]   ;;  %v2023_v31 = vld [vmem:[%s2739_s0 + $0x1e8] ss:$16 sps:$4 sm:$0xff]  }
  0x58   :  { %1885 = vmatprep.subr.bf16.mxu1 %v2026_v22  ;;  %v2031_v33 = vld [vmem:[%s2742_s3 + $0x38] sm:$0xff]   ;;  %v2656_v36 = vld [vmem:[%s2741_s2] ss:$0 sm:$0xff] }
  0x59   :  { %1840 = vmatpush3.bf16.msra.mxu0 %v2026_v22 }
  0x5a   :  { %1841 = vmatprep.subr.bf16.mxu0 %v2027_v25 }
  0x5b   :  { %735 = vmatmul.mubr.bf16.gmra.mrb[28].mxu0 %v1972_v57  ;;  %1893 = vmatpush3.bf16.msra.mxu1 %v2026_v22 }
  0x5c   :  { %742 = vmatprep.mubr.bf16.mxu0 %v1976_v58  ;;  %1886 = vmatprep.subr.bf16.mxu1 %v2027_v25 }
  0x5d   :  { %1842 = vmatpush3.bf16.msra.mxu0 %v2027_v25 }
  0x5e   :  { %896 = vmatmul.mubr.bf16.gmra.mrb[28].mxu1 %v1975_v59  ;;  %1843 = vmatprep.subr.bf16.mxu0 %v2028_v28 }
  0x5f   :  { %1682 = vmatprep.mubr.msk.bf16.mxu1 %vm597_vm0, %v1979_v60  ;;  %1894 = vmatpush3.bf16.msra.mxu1 %v2027_v25 }
  0x60   :  { %1887 = vmatprep.subr.bf16.mxu1 %v2028_v28 }
  0x61   :  { %1844 = vmatpush3.bf16.msra.mxu0 %v2028_v28 }
  0x62   :  { %1845 = vmatprep.subr.bf16.mxu0 %v2029_v30 }
  0x63   :  { %743 = vmatmul.mubr.bf16.gmra.mrb[32].mxu0 %v1978_v61  ;;  %1895 = vmatpush3.bf16.msra.mxu1 %v2028_v28 }
  0x64   :  { %750 = vmatprep.mubr.bf16.mxu0 %v1982_v62  ;;  %1888 = vmatprep.subr.bf16.mxu1 %v2029_v30 }
  0x65   :  { %1846 = vmatpush3.bf16.msra.mxu0 %v2029_v30 }
  0x66   :  { %904 = vmatmul.mubr.bf16.gmra.mrb[32].mxu1 %v1981_v63  ;;  %1847 = vmatprep.subr.bf16.mxu0 %v2030_v32 }
  0x67   :  { %1683 = vmatprep.mubr.msk.bf16.mxu1 %vm597_vm0, %v1985_v0  ;;  %1896 = vmatpush3.bf16.msra.mxu1 %v2029_v30 }
  0x68   :  { %1889 = vmatprep.subr.bf16.mxu1 %v2030_v32 }
  0x69   :  { %1848 = vmatpush3.bf16.msra.mxu0 %v2030_v32 }
  0x6a   :  { %1849 = vmatprep.subr.bf16.mxu0 %v2031_v33 }
  0x6b   :  { %751 = vmatmul.mubr.bf16.gmra.mrb[36].mxu0 %v1984_v1  ;;  %1897 = vmatpush3.bf16.msra.mxu1 %v2030_v32 }
  0x6c   :  { %758 = vmatprep.mubr.bf16.mxu0 %v1988_v2  ;;  %1890 = vmatprep.subr.bf16.mxu1 %v2031_v33 }
  0x6d   :  { %1850 = vmatpush3.bf16.msra.mxu0 %v2031_v33 }
  0x6e   :  { %912 = vmatmul.mubr.bf16.gmra.mrb[36].mxu1 %v1987_v3 }
  0x6f   :  { %1684 = vmatprep.mubr.msk.bf16.mxu1 %vm597_vm0, %v1991_v4  ;;  %1898 = vmatpush3.bf16.msra.mxu1 %v2031_v33 }
  0x73   :  { %759 = vmatmul.mubr.bf16.gmra.mrb[40].mxu0 %v1990_v5 }
  0x74   :  { %766 = vmatprep.mubr.bf16.mxu0 %v1994_v6 }
  0x76   :  { %920 = vmatmul.mubr.bf16.gmra.mrb[40].mxu1 %v1993_v7 }
  0x77   :  { %1685 = vmatprep.mubr.msk.bf16.mxu1 %vm597_vm0, %v1997_v8 }
  0x7b   :  { %767 = vmatmul.mubr.bf16.gmra.mrb[44].mxu0 %v1996_v9 }
  0x7c   :  { %774 = vmatprep.mubr.bf16.mxu0 %v2000_v10 }
  0x7e   :  { %928 = vmatmul.mubr.bf16.gmra.mrb[44].mxu1 %v1999_v11 }
  0x7f   :  { %1686 = vmatprep.mubr.msk.bf16.mxu1 %vm597_vm0, %v2003_v12 }
  0x83   :  { %775 = vmatmul.mubr.bf16.gmra.mrb[48].mxu0 %v2002_v13 }
  0x84   :  { %782 = vmatprep.mubr.bf16.mxu0 %v2006_v14 }
  0x86   :  { %936 = vmatmul.mubr.bf16.gmra.mrb[48].mxu1 %v2005_v15 }
  0x87   :  { %1687 = vmatprep.mubr.msk.bf16.mxu1 %vm597_vm0, %v2009_v16 }
  0x8b   :  { %783 = vmatmul.mubr.bf16.gmra.mrb[52].mxu0 %v2008_v17 }
  0x8c   :  { %790 = vmatprep.mubr.bf16.mxu0 %v2012_v18 }
  0x8e   :  { %944 = vmatmul.mubr.bf16.gmra.mrb[52].mxu1 %v2011_v20 }
  0x8f   :  { %1688 = vmatprep.mubr.msk.bf16.mxu1 %vm597_vm0, %v2015_v21 }
  0x93   :  { %791 = vmatmul.mubr.bf16.gmra.mrb[56].mxu0 %v2014_v23 }
  0x94   :  { %798 = vmatprep.mubr.bf16.mxu0 %v2018_v24 }
  0x96   :  { %952 = vmatmul.mubr.bf16.gmra.mrb[56].mxu1 %v2017_v26 }
  0x97   :  { %1689 = vmatprep.mubr.msk.bf16.mxu1 %vm597_vm0, %v2021_v27 }
  0x9b   :  { %799 = vmatmul.mubr.bf16.gmra.mrb[60].mxu0 %v2020_v29 }
  0x9e   :  { %960 = vmatmul.mubr.bf16.gmra.mrb[60].mxu1 %v2023_v31 }
  0xf6   :  { %v1715_v34 = vpop.f32.mrb[0].mxu0 }
  0xf7   :  { %v1716_v35 = vpop.f32.mrb[1].mxu0 }
  0xf8   :  { %v1717_v37 = vadd.f32 %v1716_v35, %v1715_v34  ;;  %v1718_v38 = vpop.f32.mrb[2].mxu0 }
  0xf9   :  { %v1719_v39 = vpop.f32.mrb[3].mxu0  ;;  %v841_v40 = vpop.f32.mrb[0].mxu1 }
  0xfa   :  { %v1720_v41 = vadd.f32 %v1719_v39, %v1718_v38  ;;  %v681_v42 = vadd.f32 %v1717_v37, %v2656_v36  ;;  %v843_v43 = vpop.f32.mrb[1].mxu1 }
  0xfb   :  { %v844_v44 = vpop.f32.mrb[2].mxu1 }
  0xfc   :  { %v842_v45 = vadd.f32 %v841_v40, %v681_v42  ;;  %v684_v46 = vadd.f32 %v1720_v41, %v2656_v36  ;;  %v846_v47 = vpop.f32.mrb[3].mxu1 }
  0xfe   :  { %v968_v48 = vsub.f32 0.0, %v842_v45  ;;  %v845_v49 = vadd.f32 %v844_v44, %v684_v46  ;;  %v1721_v50 = vpop.f32.mrb[4].mxu0 }
  0xff   :  { %v1722_v51 = vpop.f32.mrb[5].mxu0 }
 0x100   :  { %v1000_v52 = vmul.f32 1.442695, %v968_v48  ;;  %v969_v53 = vsub.f32 0.0, %v845_v49  ;;  %v1723_v54 = vadd.f32 %v1722_v51, %v1721_v50  ;;  %v1724_v55 = vpop.f32.mrb[6].mxu0 }
 0x101   :  { %v1725_v56 = vpop.f32.mrb[7].mxu0  ;;  %v849_v57 = vpop.f32.mrb[4].mxu1 }
 0x102   :  { %2032 = vpow2.f32 %v1000_v52  ;;  %v1002_v58 = vmul.f32 1.442695, %v969_v53  ;;  %v1726_v59 = vadd.f32 %v1725_v56, %v1724_v55  ;;  %v689_v60 = vadd.f32 %v1723_v54, %v2656_v36  ;;  %v851_v61 = vpop.f32.mrb[5].mxu1 }
 0x103   :  { %v852_v62 = vpop.f32.mrb[6].mxu1 }
 0x104   :  { %2034 = vpow2.f32 %v1002_v58  ;;  %v850_v63 = vadd.f32 %v849_v57, %v689_v60  ;;  %v692_v0 = vadd.f32 %v1726_v59, %v2656_v36  ;;  %v854_v1 = vpop.f32.mrb[7].mxu1 }
 0x106   :  { %v970_v2 = vsub.f32 0.0, %v850_v63  ;;  %v853_v3 = vadd.f32 %v852_v62, %v692_v0  ;;  %v1727_v4 = vpop.f32.mrb[8].mxu0 }
 0x107   :  { %v1728_v5 = vpop.f32.mrb[9].mxu0 }
 0x108   :  { %v1004_v6 = vmul.f32 1.442695, %v970_v2  ;;  %v971_v7 = vsub.f32 0.0, %v853_v3  ;;  %v1729_v8 = vadd.f32 %v1728_v5, %v1727_v4  ;;  %v1730_v9 = vpop.f32.mrb[10].mxu0 }
 0x109   :  { %v1731_v10 = vpop.f32.mrb[11].mxu0  ;;  %v857_v11 = vpop.f32.mrb[8].mxu1 }
 0x10a   :  { %2036 = vpow2.f32 %v1004_v6  ;;  %v1006_v12 = vmul.f32 1.442695, %v971_v7  ;;  %v1732_v13 = vadd.f32 %v1731_v10, %v1730_v9  ;;  %v697_v14 = vadd.f32 %v1729_v8, %v2656_v36  ;;  %v859_v15 = vpop.f32.mrb[9].mxu1 }
 0x10b   :  { %v860_v16 = vpop.f32.mrb[10].mxu1 }
 0x10c   :  { %v2033_v17 = vpop.eup %2032  ;;  %2038 = vpow2.f32 %v1006_v12  ;;  %v858_v18 = vadd.f32 %v857_v11, %v697_v14  ;;  %v700_v19 = vadd.f32 %v1732_v13, %v2656_v36  ;;  %v862_v20 = vpop.f32.mrb[11].mxu1 }
 0x10d   :  { %v1064_v21 = vadd.f32 1.0, %v2033_v17 }
 0x10e   :  { %v2035_v22 = vpop.eup %2034  ;;  %v972_v23 = vsub.f32 0.0, %v858_v18  ;;  %v861_v24 = vadd.f32 %v860_v16, %v700_v19  ;;  %v1733_v25 = vpop.f32.mrb[12].mxu0 }
 0x10f   :  { %v1065_v26 = vadd.f32 1.0, %v2035_v22  ;;  %v1734_v27 = vpop.f32.mrb[13].mxu0  ;;  %2040 = vrcp.f32 %v1064_v21 }
 0x110   :  { %v1008_v28 = vmul.f32 1.442695, %v972_v23  ;;  %v973_v29 = vsub.f32 0.0, %v861_v24  ;;  %v1735_v30 = vadd.f32 %v1734_v27, %v1733_v25  ;;  %v1736_v31 = vpop.f32.mrb[14].mxu0 }
 0x111   :  { %2042 = vrcp.f32 %v1065_v26  ;;  %v1737_v32 = vpop.f32.mrb[15].mxu0  ;;  %v865_v33 = vpop.f32.mrb[12].mxu1 }
 0x112   :  { %2044 = vpow2.f32 %v1008_v28  ;;  %v1010_v34 = vmul.f32 1.442695, %v973_v29  ;;  %v1738_v35 = vadd.f32 %v1737_v32, %v1736_v31  ;;  %v705_v37 = vadd.f32 %v1735_v30, %v2656_v36  ;;  %v867_v38 = vpop.f32.mrb[13].mxu1 }
 0x113   :  { %v868_v39 = vpop.f32.mrb[14].mxu1 }
 0x114   :  { %v2037_v40 = vpop.eup %2036  ;;  %2046 = vpow2.f32 %v1010_v34  ;;  %v866_v41 = vadd.f32 %v865_v33, %v705_v37  ;;  %v708_v42 = vadd.f32 %v1738_v35, %v2656_v36  ;;  %v870_v43 = vpop.f32.mrb[15].mxu1 }
 0x115   :  { %v1066_v44 = vadd.f32 1.0, %v2037_v40 }
 0x116   :  { %v2039_v45 = vpop.eup %2038  ;;  %v974_v46 = vsub.f32 0.0, %v866_v41  ;;  %v869_v47 = vadd.f32 %v868_v39, %v708_v42  ;;  %v1739_v48 = vpop.f32.mrb[16].mxu0 }
 0x117   :  { %v1067_v49 = vadd.f32 1.0, %v2039_v45  ;;  %v1740_v50 = vpop.f32.mrb[17].mxu0  ;;  %2048 = vrcp.f32 %v1066_v44 }
 0x118   :  { %v1012_v51 = vmul.f32 1.442695, %v974_v46  ;;  %v975_v52 = vsub.f32 0.0, %v869_v47  ;;  %v1741_v53 = vadd.f32 %v1740_v50, %v1739_v48  ;;  %v1742_v54 = vpop.f32.mrb[18].mxu0 }
 0x119   :  { %2050 = vrcp.f32 %v1067_v49  ;;  %v1743_v55 = vpop.f32.mrb[19].mxu0  ;;  %v873_v56 = vpop.f32.mrb[16].mxu1 }
 0x11a   :  { %v2041_v57 = vpop.eup %2040  ;;  %2052 = vpow2.f32 %v1012_v51  ;;  %v1014_v58 = vmul.f32 1.442695, %v975_v52  ;;  %v1744_v59 = vadd.f32 %v1743_v55, %v1742_v54  ;;  %v713_v60 = vadd.f32 %v1741_v53, %v2656_v36  ;;  %v875_v61 = vpop.f32.mrb[17].mxu1 }
 0x11b   :  { %v2043_v62 = vpop.eup %2042  ;;  %v876_v63 = vpop.f32.mrb[18].mxu1 }
 0x11c   :  { %v2045_v0 = vpop.eup %2044  ;;  %2054 = vpow2.f32 %v1014_v58  ;;  %v874_v1 = vadd.f32 %v873_v56, %v713_v60  ;;  %v716_v2 = vadd.f32 %v1744_v59, %v2656_v36  ;;  %v878_v3 = vpop.f32.mrb[19].mxu1  ;;  %v1128_v4 = vpack.c.bf16 %v2043_v62, %v2041_v57 }
 0x11d   :  { %v1068_v5 = vadd.f32 1.0, %v2045_v0 }
 0x11e   :  { %v2047_v6 = vpop.eup %2046  ;;  %v976_v7 = vsub.f32 0.0, %v874_v1  ;;  %v877_v8 = vadd.f32 %v876_v63, %v716_v2  ;;  %v1745_v9 = vpop.f32.mrb[20].mxu0  ;;  %1851 = vmatprep.mubr.bf16.mxu0 %v1128_v4 }
 0x11f   :  { %v1069_v10 = vadd.f32 1.0, %v2047_v6  ;;  %v1746_v11 = vpop.f32.mrb[21].mxu0  ;;  %2056 = vrcp.f32 %v1068_v5 }
 0x120   :  { %v1016_v12 = vmul.f32 1.442695, %v976_v7  ;;  %v977_v13 = vsub.f32 0.0, %v877_v8  ;;  %v1747_v14 = vadd.f32 %v1746_v11, %v1745_v9  ;;  %v1748_v15 = vpop.f32.mrb[22].mxu0 }
 0x121   :  { %2058 = vrcp.f32 %v1069_v10  ;;  %v1749_v16 = vpop.f32.mrb[23].mxu0  ;;  %v881_v17 = vpop.f32.mrb[20].mxu1 }
 0x122   :  { %v2049_v18 = vpop.eup %2048  ;;  %2060 = vpow2.f32 %v1016_v12  ;;  %v1018_v19 = vmul.f32 1.442695, %v977_v13  ;;  %v1750_v20 = vadd.f32 %v1749_v16, %v1748_v15  ;;  %v721_v21 = vadd.f32 %v1747_v14, %v2656_v36  ;;  %v883_v22 = vpop.f32.mrb[21].mxu1 }
 0x123   :  { %v2051_v23 = vpop.eup %2050  ;;  %v884_v24 = vpop.f32.mrb[22].mxu1 }
 0x124   :  { %v2053_v25 = vpop.eup %2052  ;;  %2062 = vpow2.f32 %v1018_v19  ;;  %v882_v26 = vadd.f32 %v881_v17, %v721_v21  ;;  %v724_v27 = vadd.f32 %v1750_v20, %v2656_v36  ;;  %v886_v28 = vpop.f32.mrb[23].mxu1  ;;  %v1129_v29 = vpack.c.bf16 %v2051_v23, %v2049_v18 }
 0x125   :  { %v1070_v30 = vadd.f32 1.0, %v2053_v25 }
 0x126   :  { %v2055_v31 = vpop.eup %2054  ;;  %v978_v32 = vsub.f32 0.0, %v882_v26  ;;  %v885_v33 = vadd.f32 %v884_v24, %v724_v27  ;;  %v1751_v34 = vpop.f32.mrb[24].mxu0  ;;  %1852 = vmatmul.mubr.bf16.vlgmr.msra.gmra.mrb[64].mxu0 %v1129_v29 }
 0x127   :  { %v1071_v35 = vadd.f32 1.0, %v2055_v31  ;;  %v1752_v37 = vpop.f32.mrb[25].mxu0  ;;  %2064 = vrcp.f32 %v1070_v30 }
 0x128   :  { %v1020_v38 = vmul.f32 1.442695, %v978_v32  ;;  %v979_v39 = vsub.f32 0.0, %v885_v33  ;;  %v1753_v40 = vadd.f32 %v1752_v37, %v1751_v34  ;;  %v1754_v41 = vpop.f32.mrb[26].mxu0 }
 0x129   :  { %2066 = vrcp.f32 %v1071_v35  ;;  %v1755_v42 = vpop.f32.mrb[27].mxu0  ;;  %v889_v43 = vpop.f32.mrb[24].mxu1 }
 0x12a   :  { %v2057_v44 = vpop.eup %2056  ;;  %2068 = vpow2.f32 %v1020_v38  ;;  %v1022_v45 = vmul.f32 1.442695, %v979_v39  ;;  %v1756_v46 = vadd.f32 %v1755_v42, %v1754_v41  ;;  %v729_v47 = vadd.f32 %v1753_v40, %v2656_v36  ;;  %v891_v48 = vpop.f32.mrb[25].mxu1 }
 0x12b   :  { %v2059_v49 = vpop.eup %2058  ;;  %v892_v50 = vpop.f32.mrb[26].mxu1 }
 0x12c   :  { %v2061_v51 = vpop.eup %2060  ;;  %2070 = vpow2.f32 %v1022_v45  ;;  %v890_v52 = vadd.f32 %v889_v43, %v729_v47  ;;  %v732_v53 = vadd.f32 %v1756_v46, %v2656_v36  ;;  %v894_v54 = vpop.f32.mrb[27].mxu1  ;;  %v1130_v55 = vpack.c.bf16 %v2059_v49, %v2057_v44 }
 0x12d   :  { %v1072_v56 = vadd.f32 1.0, %v2061_v51 }
 0x12e   :  { %v2063_v57 = vpop.eup %2062  ;;  %v980_v58 = vsub.f32 0.0, %v890_v52  ;;  %v893_v59 = vadd.f32 %v892_v50, %v732_v53  ;;  %v1757_v60 = vpop.f32.mrb[28].mxu0  ;;  %1855 = vmatprep.mubr.bf16.mxu0 %v1130_v55 }
 0x12f   :  { %v1073_v61 = vadd.f32 1.0, %v2063_v57  ;;  %v1758_v62 = vpop.f32.mrb[29].mxu0  ;;  %2072 = vrcp.f32 %v1072_v56 }
 0x130   :  { %v1024_v63 = vmul.f32 1.442695, %v980_v58  ;;  %v981_v0 = vsub.f32 0.0, %v893_v59  ;;  %v1759_v1 = vadd.f32 %v1758_v62, %v1757_v60  ;;  %v1760_v2 = vpop.f32.mrb[30].mxu0 }
 0x131   :  { %2074 = vrcp.f32 %v1073_v61  ;;  %v1761_v3 = vpop.f32.mrb[31].mxu0  ;;  %v897_v4 = vpop.f32.mrb[28].mxu1 }
 0x132   :  { %v2065_v5 = vpop.eup %2064  ;;  %2076 = vpow2.f32 %v1024_v63  ;;  %v1026_v6 = vmul.f32 1.442695, %v981_v0  ;;  %v1762_v7 = vadd.f32 %v1761_v3, %v1760_v2  ;;  %v737_v8 = vadd.f32 %v1759_v1, %v2656_v36  ;;  %v899_v9 = vpop.f32.mrb[29].mxu1 }
 0x133   :  { %v2067_v10 = vpop.eup %2066  ;;  %v900_v11 = vpop.f32.mrb[30].mxu1 }
 0x134   :  { %v2069_v12 = vpop.eup %2068  ;;  %2078 = vpow2.f32 %v1026_v6  ;;  %v898_v13 = vadd.f32 %v897_v4, %v737_v8  ;;  %v740_v14 = vadd.f32 %v1762_v7, %v2656_v36  ;;  %v902_v15 = vpop.f32.mrb[31].mxu1  ;;  %v1131_v16 = vpack.c.bf16 %v2067_v10, %v2065_v5 }
 0x135   :  { %v1074_v17 = vadd.f32 1.0, %v2069_v12 }
 0x136   :  { %v2071_v18 = vpop.eup %2070  ;;  %v982_v19 = vsub.f32 0.0, %v898_v13  ;;  %v901_v20 = vadd.f32 %v900_v11, %v740_v14  ;;  %v1763_v21 = vpop.f32.mrb[32].mxu0  ;;  %1856 = vmatmul.mubr.bf16.gmra.mrb[68].mxu0 %v1131_v16 }
 0x137   :  { %v1075_v22 = vadd.f32 1.0, %v2071_v18  ;;  %v1764_v23 = vpop.f32.mrb[33].mxu0  ;;  %2080 = vrcp.f32 %v1074_v17 }
 0x138   :  { %v1028_v24 = vmul.f32 1.442695, %v982_v19  ;;  %v983_v25 = vsub.f32 0.0, %v901_v20  ;;  %v1765_v26 = vadd.f32 %v1764_v23, %v1763_v21  ;;  %v1766_v27 = vpop.f32.mrb[34].mxu0 }
 0x139   :  { %2082 = vrcp.f32 %v1075_v22  ;;  %v1767_v28 = vpop.f32.mrb[35].mxu0  ;;  %v905_v29 = vpop.f32.mrb[32].mxu1 }
 0x13a   :  { %v2073_v30 = vpop.eup %2072  ;;  %2084 = vpow2.f32 %v1028_v24  ;;  %v1030_v31 = vmul.f32 1.442695, %v983_v25  ;;  %v1768_v32 = vadd.f32 %v1767_v28, %v1766_v27  ;;  %v745_v33 = vadd.f32 %v1765_v26, %v2656_v36  ;;  %v907_v34 = vpop.f32.mrb[33].mxu1 }
 0x13b   :  { %v2075_v35 = vpop.eup %2074  ;;  %v908_v37 = vpop.f32.mrb[34].mxu1 }
 0x13c   :  { %v2077_v38 = vpop.eup %2076  ;;  %2086 = vpow2.f32 %v1030_v31  ;;  %v906_v39 = vadd.f32 %v905_v29, %v745_v33  ;;  %v748_v40 = vadd.f32 %v1768_v32, %v2656_v36  ;;  %v910_v41 = vpop.f32.mrb[35].mxu1  ;;  %v1132_v42 = vpack.c.bf16 %v2075_v35, %v2073_v30 }
 0x13d   :  { %v1076_v43 = vadd.f32 1.0, %v2077_v38 }
 0x13e   :  { %v2079_v44 = vpop.eup %2078  ;;  %v984_v45 = vsub.f32 0.0, %v906_v39  ;;  %v909_v46 = vadd.f32 %v908_v37, %v748_v40  ;;  %v1769_v47 = vpop.f32.mrb[36].mxu0  ;;  %1859 = vmatprep.mubr.bf16.mxu0 %v1132_v42 }
 0x13f   :  { %v1077_v48 = vadd.f32 1.0, %v2079_v44  ;;  %v1770_v49 = vpop.f32.mrb[37].mxu0  ;;  %2088 = vrcp.f32 %v1076_v43 }
 0x140   :  { %v1032_v50 = vmul.f32 1.442695, %v984_v45  ;;  %v985_v51 = vsub.f32 0.0, %v909_v46  ;;  %v1771_v52 = vadd.f32 %v1770_v49, %v1769_v47  ;;  %v1772_v53 = vpop.f32.mrb[38].mxu0 }
 0x141   :  { %2090 = vrcp.f32 %v1077_v48  ;;  %v1773_v54 = vpop.f32.mrb[39].mxu0  ;;  %v913_v55 = vpop.f32.mrb[36].mxu1 }
 0x142   :  { %v2081_v56 = vpop.eup %2080  ;;  %2092 = vpow2.f32 %v1032_v50  ;;  %v1034_v57 = vmul.f32 1.442695, %v985_v51  ;;  %v1774_v58 = vadd.f32 %v1773_v54, %v1772_v53  ;;  %v753_v59 = vadd.f32 %v1771_v52, %v2656_v36  ;;  %v915_v60 = vpop.f32.mrb[37].mxu1 }
 0x143   :  { %v2083_v61 = vpop.eup %2082  ;;  %v916_v62 = vpop.f32.mrb[38].mxu1 }
 0x144   :  { %v2085_v63 = vpop.eup %2084  ;;  %2094 = vpow2.f32 %v1034_v57  ;;  %v914_v0 = vadd.f32 %v913_v55, %v753_v59  ;;  %v756_v1 = vadd.f32 %v1774_v58, %v2656_v36  ;;  %v918_v2 = vpop.f32.mrb[39].mxu1  ;;  %v1133_v3 = vpack.c.bf16 %v2083_v61, %v2081_v56 }
 0x145   :  { %v1078_v4 = vadd.f32 1.0, %v2085_v63 }
 0x146   :  { %v2087_v5 = vpop.eup %2086  ;;  %v986_v6 = vsub.f32 0.0, %v914_v0  ;;  %v917_v7 = vadd.f32 %v916_v62, %v756_v1  ;;  %v1775_v8 = vpop.f32.mrb[40].mxu0  ;;  %1860 = vmatmul.mubr.bf16.gmra.mrb[72].mxu0 %v1133_v3 }
 0x147   :  { %v1079_v9 = vadd.f32 1.0, %v2087_v5  ;;  %v1776_v10 = vpop.f32.mrb[41].mxu0  ;;  %2096 = vrcp.f32 %v1078_v4 }
 0x148   :  { %v1036_v11 = vmul.f32 1.442695, %v986_v6  ;;  %v987_v12 = vsub.f32 0.0, %v917_v7  ;;  %v1777_v13 = vadd.f32 %v1776_v10, %v1775_v8  ;;  %v1778_v14 = vpop.f32.mrb[42].mxu0 }
 0x149   :  { %2098 = vrcp.f32 %v1079_v9  ;;  %v1779_v15 = vpop.f32.mrb[43].mxu0  ;;  %v921_v16 = vpop.f32.mrb[40].mxu1 }
 0x14a   :  { %v2089_v17 = vpop.eup %2088  ;;  %2100 = vpow2.f32 %v1036_v11  ;;  %v1038_v18 = vmul.f32 1.442695, %v987_v12  ;;  %v1780_v19 = vadd.f32 %v1779_v15, %v1778_v14  ;;  %v761_v20 = vadd.f32 %v1777_v13, %v2656_v36  ;;  %v923_v21 = vpop.f32.mrb[41].mxu1 }
 0x14b   :  { %v2091_v22 = vpop.eup %2090  ;;  %v924_v23 = vpop.f32.mrb[42].mxu1 }
 0x14c   :  { %v2093_v24 = vpop.eup %2092  ;;  %2102 = vpow2.f32 %v1038_v18  ;;  %v922_v25 = vadd.f32 %v921_v16, %v761_v20  ;;  %v764_v26 = vadd.f32 %v1780_v19, %v2656_v36  ;;  %v926_v27 = vpop.f32.mrb[43].mxu1  ;;  %v1134_v28 = vpack.c.bf16 %v2091_v22, %v2089_v17 }
 0x14d   :  { %v1080_v29 = vadd.f32 1.0, %v2093_v24 }
 0x14e   :  { %v2095_v30 = vpop.eup %2094  ;;  %v988_v31 = vsub.f32 0.0, %v922_v25  ;;  %v925_v32 = vadd.f32 %v924_v23, %v764_v26  ;;  %v1781_v33 = vpop.f32.mrb[44].mxu0  ;;  %1863 = vmatprep.mubr.bf16.mxu0 %v1134_v28 }
 0x14f   :  { %v1081_v34 = vadd.f32 1.0, %v2095_v30  ;;  %v1782_v35 = vpop.f32.mrb[45].mxu0  ;;  %2104 = vrcp.f32 %v1080_v29 }
 0x150   :  { %v1040_v37 = vmul.f32 1.442695, %v988_v31  ;;  %v989_v38 = vsub.f32 0.0, %v925_v32  ;;  %v1783_v39 = vadd.f32 %v1782_v35, %v1781_v33  ;;  %v1784_v40 = vpop.f32.mrb[46].mxu0 }
 0x151   :  { %2106 = vrcp.f32 %v1081_v34  ;;  %v1785_v41 = vpop.f32.mrb[47].mxu0  ;;  %v929_v42 = vpop.f32.mrb[44].mxu1 }
 0x152   :  { %v2097_v43 = vpop.eup %2096  ;;  %2108 = vpow2.f32 %v1040_v37  ;;  %v1042_v44 = vmul.f32 1.442695, %v989_v38  ;;  %v1786_v45 = vadd.f32 %v1785_v41, %v1784_v40  ;;  %v769_v46 = vadd.f32 %v1783_v39, %v2656_v36  ;;  %v931_v47 = vpop.f32.mrb[45].mxu1 }
 0x153   :  { %v2099_v48 = vpop.eup %2098  ;;  %v932_v49 = vpop.f32.mrb[46].mxu1 }
 0x154   :  { %v2101_v50 = vpop.eup %2100  ;;  %2110 = vpow2.f32 %v1042_v44  ;;  %v930_v51 = vadd.f32 %v929_v42, %v769_v46  ;;  %v772_v52 = vadd.f32 %v1786_v45, %v2656_v36  ;;  %v934_v53 = vpop.f32.mrb[47].mxu1  ;;  %v1135_v54 = vpack.c.bf16 %v2099_v48, %v2097_v43 }
 0x155   :  { %v1082_v55 = vadd.f32 1.0, %v2101_v50 }
 0x156   :  { %v2103_v56 = vpop.eup %2102  ;;  %v990_v57 = vsub.f32 0.0, %v930_v51  ;;  %v933_v58 = vadd.f32 %v932_v49, %v772_v52  ;;  %v1787_v59 = vpop.f32.mrb[48].mxu0  ;;  %1864 = vmatmul.mubr.bf16.gmra.mrb[76].mxu0 %v1135_v54 }
 0x157   :  { %v1083_v60 = vadd.f32 1.0, %v2103_v56  ;;  %v1788_v61 = vpop.f32.mrb[49].mxu0  ;;  %2112 = vrcp.f32 %v1082_v55 }
 0x158   :  { %v1044_v62 = vmul.f32 1.442695, %v990_v57  ;;  %v991_v63 = vsub.f32 0.0, %v933_v58  ;;  %v1789_v0 = vadd.f32 %v1788_v61, %v1787_v59  ;;  %v1790_v1 = vpop.f32.mrb[50].mxu0 }
 0x159   :  { %2114 = vrcp.f32 %v1083_v60  ;;  %v1791_v2 = vpop.f32.mrb[51].mxu0  ;;  %v937_v3 = vpop.f32.mrb[48].mxu1 }
 0x15a   :  { %v2105_v4 = vpop.eup %2104  ;;  %2116 = vpow2.f32 %v1044_v62  ;;  %v1046_v5 = vmul.f32 1.442695, %v991_v63  ;;  %v1792_v6 = vadd.f32 %v1791_v2, %v1790_v1  ;;  %v777_v7 = vadd.f32 %v1789_v0, %v2656_v36  ;;  %v939_v8 = vpop.f32.mrb[49].mxu1 }
 0x15b   :  { %v2107_v9 = vpop.eup %2106  ;;  %v940_v10 = vpop.f32.mrb[50].mxu1 }
 0x15c   :  { %v2109_v11 = vpop.eup %2108  ;;  %2118 = vpow2.f32 %v1046_v5  ;;  %v938_v12 = vadd.f32 %v937_v3, %v777_v7  ;;  %v780_v13 = vadd.f32 %v1792_v6, %v2656_v36  ;;  %v942_v14 = vpop.f32.mrb[51].mxu1  ;;  %v1136_v15 = vpack.c.bf16 %v2107_v9, %v2105_v4 }
 0x15d   :  { %v1084_v16 = vadd.f32 1.0, %v2109_v11 }
 0x15e   :  { %v2111_v17 = vpop.eup %2110  ;;  %v992_v18 = vsub.f32 0.0, %v938_v12  ;;  %v941_v19 = vadd.f32 %v940_v10, %v780_v13  ;;  %v1793_v20 = vpop.f32.mrb[52].mxu0  ;;  %1867 = vmatprep.mubr.bf16.mxu0 %v1136_v15 }
 0x15f   :  { %v1085_v21 = vadd.f32 1.0, %v2111_v17  ;;  %v1794_v22 = vpop.f32.mrb[53].mxu0  ;;  %2120 = vrcp.f32 %v1084_v16 }
 0x160   :  { %v1048_v23 = vmul.f32 1.442695, %v992_v18  ;;  %v993_v24 = vsub.f32 0.0, %v941_v19  ;;  %v1795_v25 = vadd.f32 %v1794_v22, %v1793_v20  ;;  %v1796_v26 = vpop.f32.mrb[54].mxu0 }
 0x161   :  { %2122 = vrcp.f32 %v1085_v21  ;;  %v1797_v27 = vpop.f32.mrb[55].mxu0  ;;  %v945_v28 = vpop.f32.mrb[52].mxu1 }
 0x162   :  { %v2113_v29 = vpop.eup %2112  ;;  %2124 = vpow2.f32 %v1048_v23  ;;  %v1050_v30 = vmul.f32 1.442695, %v993_v24  ;;  %v1798_v31 = vadd.f32 %v1797_v27, %v1796_v26  ;;  %v785_v32 = vadd.f32 %v1795_v25, %v2656_v36  ;;  %v947_v33 = vpop.f32.mrb[53].mxu1 }
 0x163   :  { %v2115_v34 = vpop.eup %2114  ;;  %v948_v35 = vpop.f32.mrb[54].mxu1 }
 0x164   :  { %v2117_v37 = vpop.eup %2116  ;;  %2126 = vpow2.f32 %v1050_v30  ;;  %v946_v38 = vadd.f32 %v945_v28, %v785_v32  ;;  %v788_v39 = vadd.f32 %v1798_v31, %v2656_v36  ;;  %v950_v40 = vpop.f32.mrb[55].mxu1  ;;  %v1137_v41 = vpack.c.bf16 %v2115_v34, %v2113_v29 }
 0x165   :  { %v1086_v42 = vadd.f32 1.0, %v2117_v37 }
 0x166   :  { %v2119_v43 = vpop.eup %2118  ;;  %v994_v44 = vsub.f32 0.0, %v946_v38  ;;  %v949_v45 = vadd.f32 %v948_v35, %v788_v39  ;;  %v1799_v46 = vpop.f32.mrb[56].mxu0  ;;  %1868 = vmatmul.mubr.bf16.gmra.mrb[80].mxu0 %v1137_v41 }
 0x167   :  { %v1087_v47 = vadd.f32 1.0, %v2119_v43  ;;  %v1800_v48 = vpop.f32.mrb[57].mxu0  ;;  %2128 = vrcp.f32 %v1086_v42 }
 0x168   :  { %v1052_v49 = vmul.f32 1.442695, %v994_v44  ;;  %v995_v50 = vsub.f32 0.0, %v949_v45  ;;  %v1801_v51 = vadd.f32 %v1800_v48, %v1799_v46  ;;  %v1802_v52 = vpop.f32.mrb[58].mxu0 }
 0x169   :  { %2130 = vrcp.f32 %v1087_v47  ;;  %v1803_v53 = vpop.f32.mrb[59].mxu0  ;;  %v953_v54 = vpop.f32.mrb[56].mxu1 }
 0x16a   :  { %v2121_v55 = vpop.eup %2120  ;;  %2132 = vpow2.f32 %v1052_v49  ;;  %v1054_v56 = vmul.f32 1.442695, %v995_v50  ;;  %v1804_v57 = vadd.f32 %v1803_v53, %v1802_v52  ;;  %v793_v58 = vadd.f32 %v1801_v51, %v2656_v36  ;;  %v955_v59 = vpop.f32.mrb[57].mxu1 }
 0x16b   :  { %v2123_v60 = vpop.eup %2122  ;;  %v956_v61 = vpop.f32.mrb[58].mxu1 }
 0x16c   :  { %v2125_v62 = vpop.eup %2124  ;;  %2134 = vpow2.f32 %v1054_v56  ;;  %v954_v63 = vadd.f32 %v953_v54, %v793_v58  ;;  %v796_v0 = vadd.f32 %v1804_v57, %v2656_v36  ;;  %v958_v1 = vpop.f32.mrb[59].mxu1  ;;  %v1138_v2 = vpack.c.bf16 %v2123_v60, %v2121_v55  ;;  %v2693_v56 = vld [vmem:[%s2743_s4] ss:$0 sm:$0xff]  ;;  %s2313_s4 = smov [#allocation2]  }
 0x16d   :  { %v1088_v3 = vadd.f32 1.0, %v2125_v62  ;;  %s1573_s7 = sshll.u32 %s2313_s4, 4  ;;  %s1574_s7 = int_to_ptr.vmem [resolvable:$true] %s1573_s7 }
 0x16e   :  { %v2127_v4 = vpop.eup %2126  ;;  %v996_v5 = vsub.f32 0.0, %v954_v63  ;;  %v957_v6 = vadd.f32 %v956_v61, %v796_v0  ;;  %v1805_v7 = vpop.f32.mrb[60].mxu0  ;;  %1871 = vmatprep.mubr.bf16.mxu1 %v1138_v2  ;;  %s2288_s8 = scalar_lea.vmem %s1574_s7, 4096  ;;  %p2293_p1 = scmp.lt.s32.totalorder %s1574_s7, %s1574_s7 }
 0x16f   :  { %v1089_v8 = vadd.f32 1.0, %v2127_v4  ;;  %v1806_v9 = vpop.f32.mrb[61].mxu0  ;;  %2136 = vrcp.f32 %v1088_v3  ;;  %p2289_p0 = scmp.ne.s32.totalorder %s1574_s7, %s2288_s8  ;;  %p2294_p2 = scmp.lt.s32.totalorder %s2288_s8, %s2288_s8 }
 0x170   :  { %v1056_v10 = vmul.f32 1.442695, %v996_v5  ;;  %v997_v11 = vsub.f32 0.0, %v957_v6  ;;  %v1807_v12 = vadd.f32 %v1806_v9, %v1805_v7  ;;  %v1808_v13 = vpop.f32.mrb[62].mxu0 }
 0x171   :  { %2138 = vrcp.f32 %v1089_v8  ;;  %v1809_v14 = vpop.f32.mrb[63].mxu0  ;;  %v961_v15 = vpop.f32.mrb[60].mxu1  ;;  %p2295_p3 = por %p2294_p2, %p2293_p1 }
 0x172   :  { %v2129_v16 = vpop.eup %2128  ;;  %2140 = vpow2.f32 %v1056_v10  ;;  %v1058_v17 = vmul.f32 1.442695, %v997_v11  ;;  %v1810_v18 = vadd.f32 %v1809_v14, %v1808_v13  ;;  %v801_v19 = vadd.f32 %v1807_v12, %v2656_v36  ;;  %v963_v20 = vpop.f32.mrb[61].mxu1 }
 0x173   :  { %v2131_v21 = vpop.eup %2130  ;;  %v964_v22 = vpop.f32.mrb[62].mxu1  ;;  %p2296_p4 = pnand %p2295_p3, %p2289_p0 }
 0x174   :  { %v2133_v23 = vpop.eup %2132  ;;  %2142 = vpow2.f32 %v1058_v17  ;;  %v962_v24 = vadd.f32 %v961_v15, %v801_v19  ;;  %v804_v25 = vadd.f32 %v1810_v18, %v2656_v36  ;;  %v966_v26 = vpop.f32.mrb[63].mxu1  ;;  %v1139_v27 = vpack.c.bf16 %v2131_v21, %v2129_v16 }
 0x175   :  { %v1090_v28 = vadd.f32 1.0, %v2133_v23 }
 0x176   :  { %v2135_v29 = vpop.eup %2134  ;;  %v998_v30 = vsub.f32 0.0, %v962_v24  ;;  %v965_v31 = vadd.f32 %v964_v22, %v804_v25  ;;  %1872 = vmatmul.mubr.bf16.vlgmr.msra.gmra.mrb[64].mxu1 %v1139_v27 }
 0x177   :  { %v1091_v32 = vadd.f32 1.0, %v2135_v29  ;;  %2144 = vrcp.f32 %v1090_v28 }
 0x178   :  { %v1060_v33 = vmul.f32 1.442695, %v998_v30  ;;  %v999_v34 = vsub.f32 0.0, %v965_v31 }
 0x179   :  { %2146 = vrcp.f32 %v1091_v32  ;;  %v2137_v35 = vpop.eup %2136 }
 0x17a   :  { %2148 = vpow2.f32 %v1060_v33  ;;  %v1062_v37 = vmul.f32 1.442695, %v999_v34 }
 0x17b   :  { %v2139_v38 = vpop.eup %2138 }
 0x17c   :  { %v2141_v39 = vpop.eup %2140  ;;  %2150 = vpow2.f32 %v1062_v37  ;;  %v1140_v40 = vpack.c.bf16 %v2139_v38, %v2137_v35 }
 0x17d   :  { %v1092_v36 = vadd.f32 1.0, %v2141_v39 }
 0x17e   :  { %v2143_v41 = vpop.eup %2142  ;;  %1875 = vmatprep.mubr.bf16.mxu1 %v1140_v40 }
 0x17f   :  { %v1093_v42 = vadd.f32 1.0, %v2143_v41  ;;  %2152 = vrcp.f32 %v1092_v36 }
 0x181   :  { %2154 = vrcp.f32 %v1093_v42  ;;  %v2145_v43 = vpop.eup %2144 }
 0x183   :  { %v2147_v44 = vpop.eup %2146 }
 0x184   :  { %v2149_v45 = vpop.eup %2148  ;;  %v1141_v46 = vpack.c.bf16 %v2147_v44, %v2145_v43 }
 0x185   :  { %v1094_v47 = vadd.f32 1.0, %v2149_v45 }
 0x186   :  { %v2151_v48 = vpop.eup %2150  ;;  %1876 = vmatmul.mubr.bf16.gmra.mrb[68].mxu1 %v1141_v46 }
 0x187   :  { %v1095_v49 = vadd.f32 1.0, %v2151_v48  ;;  %2156 = vrcp.f32 %v1094_v47 }
 0x189   :  { %2158 = vrcp.f32 %v1095_v49  ;;  %v2153_v50 = vpop.eup %2152 }
 0x18b   :  { %v2155_v51 = vpop.eup %2154 }
 0x18c   :  { %v1142_v52 = vpack.c.bf16 %v2155_v51, %v2153_v50 }
 0x18e   :  { %1879 = vmatprep.mubr.bf16.mxu1 %v1142_v52 }
 0x191   :  { %v2157_v53 = vpop.eup %2156 }
 0x193   :  { %v2159_v54 = vpop.eup %2158 }
 0x194   :  { %v1143_v55 = vpack.c.bf16 %v2159_v54, %v2157_v53 }
 0x196   :  { %1880 = vmatmul.mubr.bf16.gmra.mrb[72].mxu1 %v1143_v55 }
 0x1f9   :  { %v1853_v57 = vpop.f32.mrb[64].mxu0 }
 0x1fa   :  { %v1258_v58 = vadd.f32 %v1853_v57, %v2693_v56  ;;  %v1249_v59 = vpop.f32.mrb[65].mxu0 }
 0x1fb   :  { %v1250_v60 = vadd.f32 %v2693_v56, %v1249_v59  ;;  %v1854_v61 = vpop.f32.mrb[66].mxu0 }
 0x1fc   :  { %v1378_v62 = vsub.f32 0.0, %v1258_v58  ;;  %v1261_v63 = vadd.f32 %v1854_v61, %v2693_v56  ;;  %v1252_v0 = vpop.f32.mrb[67].mxu0 }
 0x1fd   :  { %v1376_v1 = vsub.f32 0.0, %v1250_v60  ;;  %v1253_v2 = vadd.f32 %v2693_v56, %v1252_v0 }
 0x1fe   :  { %v1412_v3 = vmul.f32 1.442695, %v1378_v62  ;;  %v1379_v4 = vsub.f32 0.0, %v1261_v63 }
 0x1ff   :  { %v1408_v5 = vmul.f32 1.442695, %v1376_v1  ;;  %v1377_v6 = vsub.f32 0.0, %v1253_v2 }
 0x200   :  { %2160 = vpow2.f32 %v1412_v3  ;;  %v1414_v7 = vmul.f32 1.442695, %v1379_v4 }
 0x201   :  { %2162 = vpow2.f32 %v1408_v5  ;;  %v1410_v8 = vmul.f32 1.442695, %v1377_v6 }
 0x202   :  { %2164 = vpow2.f32 %v1414_v7 }
 0x203   :  { %2166 = vpow2.f32 %v1410_v8 }
 0x209   :  { %v1857_v9 = vpop.f32.mrb[68].mxu0 }
 0x20a   :  { %v2161_v10 = vpop.eup %2160  ;;  %v1274_v11 = vadd.f32 %v1857_v9, %v2693_v56  ;;  %v1265_v12 = vpop.f32.mrb[69].mxu0 }
 0x20b   :  { %v2163_v13 = vpop.eup %2162  ;;  %v1474_v14 = vadd.f32 1.0, %v2161_v10  ;;  %v1266_v15 = vadd.f32 %v2693_v56, %v1265_v12  ;;  %v1858_v16 = vpop.f32.mrb[70].mxu0 }
 0x20c   :  { %v2165_v17 = vpop.eup %2164  ;;  %v1472_v18 = vadd.f32 1.0, %v2163_v13  ;;  %v1382_v19 = vsub.f32 0.0, %v1274_v11  ;;  %v1277_v20 = vadd.f32 %v1858_v16, %v2693_v56  ;;  %v1268_v21 = vpop.f32.mrb[71].mxu0 }
 0x20d   :  { %v2167_v22 = vpop.eup %2166  ;;  %2168 = vrcp.f32 %v1474_v14  ;;  %v1475_v23 = vadd.f32 1.0, %v2165_v17  ;;  %v1380_v24 = vsub.f32 0.0, %v1266_v15  ;;  %v1269_v25 = vadd.f32 %v2693_v56, %v1268_v21 }
 0x20e   :  { %2170 = vrcp.f32 %v1472_v18  ;;  %v1473_v26 = vadd.f32 1.0, %v2167_v22  ;;  %v1420_v27 = vmul.f32 1.442695, %v1382_v19  ;;  %v1383_v28 = vsub.f32 0.0, %v1277_v20 }
 0x20f   :  { %2172 = vrcp.f32 %v1475_v23  ;;  %v1416_v29 = vmul.f32 1.442695, %v1380_v24  ;;  %v1381_v30 = vsub.f32 0.0, %v1269_v25 }
 0x210   :  { %2174 = vrcp.f32 %v1473_v26  ;;  %v1422_v31 = vmul.f32 1.442695, %v1383_v28 }
 0x211   :  { %2176 = vpow2.f32 %v1420_v27  ;;  %v1418_v32 = vmul.f32 1.442695, %v1381_v30 }
 0x212   :  { %2178 = vpow2.f32 %v1416_v29 }
 0x213   :  { %2180 = vpow2.f32 %v1422_v31 }
 0x214   :  { %2182 = vpow2.f32 %v1418_v32 }
 0x217   :  { %v2169_v33 = vpop.eup %2168 }
 0x218   :  { %v2171_v34 = vpop.eup %2170  ;;  %1538 = vst [vmem:[#allocation2 + $0x10] sm:$0xff] %v2169_v33 }
 0x219   :  { %v2173_v35 = vpop.eup %2172  ;;  %1536 = vst [vmem:[#allocation2] sm:$0xff] %v2171_v34  ;;  %v1861_v37 = vpop.f32.mrb[72].mxu0 }
 0x21a   :  { %v2175_v38 = vpop.eup %2174  ;;  %1539 = vst [vmem:[#allocation2 + $0x18] sm:$0xff] %v2173_v35  ;;  %v1290_v39 = vadd.f32 %v1861_v37, %v2693_v56  ;;  %v1281_v40 = vpop.f32.mrb[73].mxu0 }
 0x21b   :  { %v2177_v36 = vpop.eup %2176  ;;  %1537 = vst [vmem:[#allocation2 + $0x8] sm:$0xff] %v2175_v38  ;;  %v1282_v41 = vadd.f32 %v2693_v56, %v1281_v40  ;;  %v1862_v42 = vpop.f32.mrb[74].mxu0 }
 0x21c   :  { %v2179_v43 = vpop.eup %2178  ;;  %v1478_v44 = vadd.f32 1.0, %v2177_v36  ;;  %v1386_v45 = vsub.f32 0.0, %v1290_v39  ;;  %v1293_v46 = vadd.f32 %v1862_v42, %v2693_v56  ;;  %v1284_v47 = vpop.f32.mrb[75].mxu0 }
 0x21d   :  { %v2181_v48 = vpop.eup %2180  ;;  %v1476_v49 = vadd.f32 1.0, %v2179_v43  ;;  %v1384_v50 = vsub.f32 0.0, %v1282_v41  ;;  %v1285_v51 = vadd.f32 %v2693_v56, %v1284_v47 }
 0x21e   :  { %v2183_v52 = vpop.eup %2182  ;;  %2184 = vrcp.f32 %v1478_v44  ;;  %v1479_v53 = vadd.f32 1.0, %v2181_v48  ;;  %v1428_v54 = vmul.f32 1.442695, %v1386_v45  ;;  %v1387_v55 = vsub.f32 0.0, %v1293_v46 }
 0x21f   :  { %2186 = vrcp.f32 %v1476_v49  ;;  %v1477_v57 = vadd.f32 1.0, %v2183_v52  ;;  %v1424_v58 = vmul.f32 1.442695, %v1384_v50  ;;  %v1385_v59 = vsub.f32 0.0, %v1285_v51 }
 0x220   :  { %2188 = vrcp.f32 %v1479_v53  ;;  %v1430_v60 = vmul.f32 1.442695, %v1387_v55 }
 0x221   :  { %2190 = vrcp.f32 %v1477_v57  ;;  %v1426_v61 = vmul.f32 1.442695, %v1385_v59 }
 0x222   :  { %2192 = vpow2.f32 %v1428_v54 }
 0x223   :  { %2194 = vpow2.f32 %v1424_v58 }
 0x224   :  { %2196 = vpow2.f32 %v1430_v60 }
 0x225   :  { %2198 = vpow2.f32 %v1426_v61 }
 0x228   :  { %v2185_v62 = vpop.eup %2184 }
 0x229   :  { %v2187_v63 = vpop.eup %2186  ;;  %1542 = vst [vmem:[#allocation2 + $0x30] sm:$0xff] %v2185_v62  ;;  %v1865_v0 = vpop.f32.mrb[76].mxu0 }
 0x22a   :  { %v2189_v1 = vpop.eup %2188  ;;  %1540 = vst [vmem:[#allocation2 + $0x20] sm:$0xff] %v2187_v63  ;;  %v1306_v2 = vadd.f32 %v1865_v0, %v2693_v56  ;;  %v1297_v3 = vpop.f32.mrb[77].mxu0 }
 0x22b   :  { %v2191_v4 = vpop.eup %2190  ;;  %1543 = vst [vmem:[#allocation2 + $0x38] sm:$0xff] %v2189_v1  ;;  %v1298_v5 = vadd.f32 %v2693_v56, %v1297_v3  ;;  %v1866_v6 = vpop.f32.mrb[78].mxu0 }
 0x22c   :  { %v2193_v7 = vpop.eup %2192  ;;  %1541 = vst [vmem:[#allocation2 + $0x28] sm:$0xff] %v2191_v4  ;;  %v1390_v8 = vsub.f32 0.0, %v1306_v2  ;;  %v1309_v9 = vadd.f32 %v1866_v6, %v2693_v56  ;;  %v1300_v10 = vpop.f32.mrb[79].mxu0 }
 0x22d   :  { %v2195_v11 = vpop.eup %2194  ;;  %v1482_v12 = vadd.f32 1.0, %v2193_v7  ;;  %v1388_v13 = vsub.f32 0.0, %v1298_v5  ;;  %v1301_v14 = vadd.f32 %v2693_v56, %v1300_v10 }
 0x22e   :  { %v2197_v15 = vpop.eup %2196  ;;  %v1480_v16 = vadd.f32 1.0, %v2195_v11  ;;  %v1391_v17 = vsub.f32 0.0, %v1309_v9  ;;  %v1436_v20 = vmul.f32 1.442695, %v1390_v8 }
 0x22f   :  { %v2199_v18 = vpop.eup %2198  ;;  %2200 = vrcp.f32 %v1482_v12  ;;  %v1483_v19 = vadd.f32 1.0, %v2197_v15  ;;  %v1389_v21 = vsub.f32 0.0, %v1301_v14  ;;  %v1432_v23 = vmul.f32 1.442695, %v1388_v13 }
 0x230   :  { %2202 = vrcp.f32 %v1480_v16  ;;  %v1481_v22 = vadd.f32 1.0, %v2199_v18  ;;  %v1438_v24 = vmul.f32 1.442695, %v1391_v17 }
 0x231   :  { %2204 = vrcp.f32 %v1483_v19  ;;  %v1434_v25 = vmul.f32 1.442695, %v1389_v21 }
 0x232   :  { %2206 = vrcp.f32 %v1481_v22 }
 0x233   :  { %2208 = vpow2.f32 %v1436_v20 }
 0x234   :  { %2210 = vpow2.f32 %v1432_v23 }
 0x235   :  { %2212 = vpow2.f32 %v1438_v24 }
 0x236   :  { %2214 = vpow2.f32 %v1434_v25 }
 0x239   :  { %v2201_v26 = vpop.eup %2200  ;;  %v1869_v27 = vpop.f32.mrb[80].mxu0 }
 0x23a   :  { %v2203_v28 = vpop.eup %2202  ;;  %1546 = vst [vmem:[#allocation2 + $0x50] sm:$0xff] %v2201_v26  ;;  %v1322_v29 = vadd.f32 %v1869_v27, %v2693_v56  ;;  %v1313_v30 = vpop.f32.mrb[81].mxu0 }
 0x23b   :  { %v2205_v31 = vpop.eup %2204  ;;  %1544 = vst [vmem:[#allocation2 + $0x40] sm:$0xff] %v2203_v28  ;;  %v1314_v32 = vadd.f32 %v2693_v56, %v1313_v30  ;;  %v1870_v33 = vpop.f32.mrb[82].mxu0 }
 0x23c   :  { %v2207_v34 = vpop.eup %2206  ;;  %1547 = vst [vmem:[#allocation2 + $0x58] sm:$0xff] %v2205_v31  ;;  %v1394_v35 = vsub.f32 0.0, %v1322_v29  ;;  %v1325_v37 = vadd.f32 %v1870_v33, %v2693_v56  ;;  %v1316_v38 = vpop.f32.mrb[83].mxu0 }
 0x23d   :  { %v2209_v39 = vpop.eup %2208  ;;  %1545 = vst [vmem:[#allocation2 + $0x48] sm:$0xff] %v2207_v34  ;;  %v1392_v40 = vsub.f32 0.0, %v1314_v32  ;;  %v1317_v36 = vadd.f32 %v2693_v56, %v1316_v38 }
 0x23e   :  { %v2211_v41 = vpop.eup %2210  ;;  %v1486_v42 = vadd.f32 1.0, %v2209_v39  ;;  %v1395_v43 = vsub.f32 0.0, %v1325_v37  ;;  %v1444_v49 = vmul.f32 1.442695, %v1394_v35 }
 0x23f   :  { %v2213_v44 = vpop.eup %2212  ;;  %v1484_v45 = vadd.f32 1.0, %v2211_v41  ;;  %v1393_v46 = vsub.f32 0.0, %v1317_v36  ;;  %v1440_v51 = vmul.f32 1.442695, %v1392_v40 }
 0x240   :  { %v2215_v47 = vpop.eup %2214  ;;  %2216 = vrcp.f32 %v1486_v42  ;;  %v1487_v48 = vadd.f32 1.0, %v2213_v44  ;;  %v1446_v52 = vmul.f32 1.442695, %v1395_v43 }
 0x241   :  { %2218 = vrcp.f32 %v1484_v45  ;;  %v1485_v50 = vadd.f32 1.0, %v2215_v47  ;;  %v1442_v53 = vmul.f32 1.442695, %v1393_v46 }
 0x242   :  { %2220 = vrcp.f32 %v1487_v48 }
 0x243   :  { %2222 = vrcp.f32 %v1485_v50 }
 0x244   :  { %2224 = vpow2.f32 %v1444_v49 }
 0x245   :  { %2226 = vpow2.f32 %v1440_v51 }
 0x246   :  { %2228 = vpow2.f32 %v1446_v52 }
 0x247   :  { %2230 = vpow2.f32 %v1442_v53 }
 0x249   :  { %v1873_v54 = vpop.f32.mrb[64].mxu1 }
 0x24a   :  { %v2217_v55 = vpop.eup %2216  ;;  %v1338_v57 = vadd.f32 %v1873_v54, %v2693_v56  ;;  %v1329_v58 = vpop.f32.mrb[65].mxu1 }
 0x24b   :  { %v2219_v59 = vpop.eup %2218  ;;  %1550 = vst [vmem:[#allocation2 + $0x70] sm:$0xff] %v2217_v55  ;;  %v1330_v60 = vadd.f32 %v2693_v56, %v1329_v58  ;;  %v1874_v61 = vpop.f32.mrb[66].mxu1 }
 0x24c   :  { %v2221_v62 = vpop.eup %2220  ;;  %1548 = vst [vmem:[#allocation2 + $0x60] sm:$0xff] %v2219_v59  ;;  %v1398_v63 = vsub.f32 0.0, %v1338_v57  ;;  %v1341_v0 = vadd.f32 %v1874_v61, %v2693_v56  ;;  %v1332_v1 = vpop.f32.mrb[67].mxu1 }
 0x24d   :  { %v2223_v2 = vpop.eup %2222  ;;  %1551 = vst [vmem:[#allocation2 + $0x78] sm:$0xff] %v2221_v62  ;;  %v1396_v3 = vsub.f32 0.0, %v1330_v60  ;;  %v1333_v4 = vadd.f32 %v2693_v56, %v1332_v1 }
 0x24e   :  { %v2225_v5 = vpop.eup %2224  ;;  %1549 = vst [vmem:[#allocation2 + $0x68] sm:$0xff] %v2223_v2  ;;  %v1452_v6 = vmul.f32 1.442695, %v1398_v63  ;;  %v1399_v7 = vsub.f32 0.0, %v1341_v0 }
 0x24f   :  { %v2227_v8 = vpop.eup %2226  ;;  %v1490_v9 = vadd.f32 1.0, %v2225_v5  ;;  %v1397_v10 = vsub.f32 0.0, %v1333_v4  ;;  %v1448_v15 = vmul.f32 1.442695, %v1396_v3 }
 0x250   :  { %v2229_v11 = vpop.eup %2228  ;;  %v1488_v12 = vadd.f32 1.0, %v2227_v8  ;;  %2232 = vpow2.f32 %v1452_v6  ;;  %v1454_v17 = vmul.f32 1.442695, %v1399_v7 }
 0x251   :  { %v2231_v13 = vpop.eup %2230  ;;  %2234 = vrcp.f32 %v1490_v9  ;;  %v1491_v14 = vadd.f32 1.0, %v2229_v11  ;;  %v1450_v18 = vmul.f32 1.442695, %v1397_v10 }
 0x252   :  { %2236 = vrcp.f32 %v1488_v12  ;;  %v1489_v16 = vadd.f32 1.0, %v2231_v13 }
 0x253   :  { %2238 = vrcp.f32 %v1491_v14 }
 0x254   :  { %2240 = vrcp.f32 %v1489_v16 }
 0x255   :  { %2242 = vpow2.f32 %v1448_v15 }
 0x256   :  { %2244 = vpow2.f32 %v1454_v17 }
 0x257   :  { %2246 = vpow2.f32 %v1450_v18 }
 0x259   :  { %v1877_v19 = vpop.f32.mrb[68].mxu1 }
 0x25a   :  { %v2233_v20 = vpop.eup %2232  ;;  %v1354_v21 = vadd.f32 %v1877_v19, %v2693_v56  ;;  %v1345_v22 = vpop.f32.mrb[69].mxu1 }
 0x25b   :  { %v2235_v23 = vpop.eup %2234  ;;  %v1494_v24 = vadd.f32 1.0, %v2233_v20  ;;  %v1346_v25 = vadd.f32 %v2693_v56, %v1345_v22  ;;  %v1878_v26 = vpop.f32.mrb[70].mxu1 }
 0x25c   :  { %v2237_v27 = vpop.eup %2236  ;;  %1554 = vst [vmem:[#allocation2 + $0x90] sm:$0xff] %v2235_v23  ;;  %v1402_v28 = vsub.f32 0.0, %v1354_v21  ;;  %v1357_v29 = vadd.f32 %v1878_v26, %v2693_v56  ;;  %v1348_v30 = vpop.f32.mrb[71].mxu1 }
 0x25d   :  { %v2239_v31 = vpop.eup %2238  ;;  %1552 = vst [vmem:[#allocation2 + $0x80] sm:$0xff] %v2237_v27  ;;  %2248 = vrcp.f32 %v1494_v24  ;;  %v1400_v32 = vsub.f32 0.0, %v1346_v25  ;;  %v1349_v33 = vadd.f32 %v2693_v56, %v1348_v30 }
 0x25e   :  { %v2241_v34 = vpop.eup %2240  ;;  %1555 = vst [vmem:[#allocation2 + $0x98] sm:$0xff] %v2239_v31  ;;  %v1460_v35 = vmul.f32 1.442695, %v1402_v28  ;;  %v1403_v37 = vsub.f32 0.0, %v1357_v29 }
 0x25f   :  { %v2243_v38 = vpop.eup %2242  ;;  %1553 = vst [vmem:[#allocation2 + $0x88] sm:$0xff] %v2241_v34  ;;  %v1456_v39 = vmul.f32 1.442695, %v1400_v32  ;;  %v1401_v40 = vsub.f32 0.0, %v1349_v33 }
 0x260   :  { %v2245_v36 = vpop.eup %2244  ;;  %v1492_v41 = vadd.f32 1.0, %v2243_v38  ;;  %2250 = vpow2.f32 %v1460_v35  ;;  %v1462_v44 = vmul.f32 1.442695, %v1403_v37 }
 0x261   :  { %v2247_v42 = vpop.eup %2246  ;;  %v1495_v43 = vadd.f32 1.0, %v2245_v36  ;;  %2252 = vpow2.f32 %v1456_v39  ;;  %v1458_v46 = vmul.f32 1.442695, %v1401_v40 }
 0x262   :  { %2254 = vrcp.f32 %v1492_v41  ;;  %v1493_v45 = vadd.f32 1.0, %v2247_v42 }
 0x263   :  { %2256 = vrcp.f32 %v1495_v43 }
 0x264   :  { %2258 = vrcp.f32 %v1493_v45 }
 0x265   :  { %2260 = vpow2.f32 %v1462_v44 }
 0x266   :  { %2262 = vpow2.f32 %v1458_v46 }
 0x267   :  { %v2249_v47 = vpop.eup %2248 }
 0x268   :  { %1558 = vst [vmem:[#allocation2 + $0xb0] sm:$0xff] %v2249_v47 }
 0x269   :  { %v1881_v48 = vpop.f32.mrb[72].mxu1 }
 0x26a   :  { %v2251_v49 = vpop.eup %2250  ;;  %v1370_v50 = vadd.f32 %v1881_v48, %v2693_v56  ;;  %v1361_v51 = vpop.f32.mrb[73].mxu1 }
 0x26b   :  { %v2253_v52 = vpop.eup %2252  ;;  %v1498_v53 = vadd.f32 1.0, %v2251_v49  ;;  %v1362_v54 = vadd.f32 %v2693_v56, %v1361_v51  ;;  %v1882_v55 = vpop.f32.mrb[74].mxu1 }
 0x26c   :  { %v2255_v57 = vpop.eup %2254  ;;  %v1496_v58 = vadd.f32 1.0, %v2253_v52  ;;  %v1406_v59 = vsub.f32 0.0, %v1370_v50  ;;  %v1373_v60 = vadd.f32 %v1882_v55, %v2693_v56  ;;  %v1364_v61 = vpop.f32.mrb[75].mxu1 }
 0x26d   :  { %v2257_v62 = vpop.eup %2256  ;;  %1556 = vst [vmem:[#allocation2 + $0xa0] sm:$0xff] %v2255_v57  ;;  %2264 = vrcp.f32 %v1498_v53  ;;  %v1404_v63 = vsub.f32 0.0, %v1362_v54  ;;  %v1365_v0 = vadd.f32 %v2693_v56, %v1364_v61 }
 0x26e   :  { %v2259_v1 = vpop.eup %2258  ;;  %1559 = vst [vmem:[#allocation2 + $0xb8] sm:$0xff] %v2257_v62  ;;  %2266 = vrcp.f32 %v1496_v58  ;;  %v1468_v2 = vmul.f32 1.442695, %v1406_v59  ;;  %v1407_v3 = vsub.f32 0.0, %v1373_v60 }
 0x26f   :  { %v2261_v4 = vpop.eup %2260  ;;  %1557 = vst [vmem:[#allocation2 + $0xa8] sm:$0xff] %v2259_v1  ;;  %v1464_v5 = vmul.f32 1.442695, %v1404_v63  ;;  %v1405_v6 = vsub.f32 0.0, %v1365_v0 }
 0x270   :  { %v2263_v7 = vpop.eup %2262  ;;  %v1499_v8 = vadd.f32 1.0, %v2261_v4  ;;  %2268 = vpow2.f32 %v1468_v2  ;;  %v1470_v9 = vmul.f32 1.442695, %v1407_v3 }
 0x271   :  { %v1497_v10 = vadd.f32 1.0, %v2263_v7  ;;  %2270 = vpow2.f32 %v1464_v5  ;;  %v1466_v11 = vmul.f32 1.442695, %v1405_v6 }
 0x272   :  { %2272 = vrcp.f32 %v1499_v8 }
 0x273   :  { %2274 = vrcp.f32 %v1497_v10 }
 0x274   :  { %2276 = vpow2.f32 %v1470_v9 }
 0x275   :  { %2278 = vpow2.f32 %v1466_v11 }
 0x277   :  { %v2265_v56 = vpop.eup %2264 }
 0x278   :  { %v2267_v12 = vpop.eup %2266  ;;  %1562 = vst [vmem:[#allocation2 + $0xd0] sm:$0xff] %v2265_v56 }
 0x279   :  { %1560 = vst [vmem:[#allocation2 + $0xc0] sm:$0xff] %v2267_v12 }
 0x27a   :  { %v2269_v13 = vpop.eup %2268 }
 0x27b   :  { %v2271_v14 = vpop.eup %2270  ;;  %v1502_v15 = vadd.f32 1.0, %v2269_v13 }
 0x27c   :  { %v2273_v16 = vpop.eup %2272  ;;  %v1500_v17 = vadd.f32 1.0, %v2271_v14 }
 0x27d   :  { %v2275_v18 = vpop.eup %2274  ;;  %1563 = vst [vmem:[#allocation2 + $0xd8] sm:$0xff] %v2273_v16  ;;  %2280 = vrcp.f32 %v1502_v15 }
 0x27e   :  { %v2277_v19 = vpop.eup %2276  ;;  %1561 = vst [vmem:[#allocation2 + $0xc8] sm:$0xff] %v2275_v18  ;;  %2282 = vrcp.f32 %v1500_v17 }
 0x27f   :  { %v2279_v20 = vpop.eup %2278  ;;  %v1503_v21 = vadd.f32 1.0, %v2277_v19 }
 0x280   :  { %v1501_v22 = vadd.f32 1.0, %v2279_v20 }
 0x281   :  { %2284 = vrcp.f32 %v1503_v21 }
 0x282   :  { %2286 = vrcp.f32 %v1501_v22 }
 0x287   :  { %v2281_v23 = vpop.eup %2280 }
 0x288   :  { %v2283_v24 = vpop.eup %2282  ;;  %1566 = vst [vmem:[#allocation2 + $0xf0] sm:$0xff] %v2281_v23 }
 0x289   :  { %1564 = vst [vmem:[#allocation2 + $0xe0] sm:$0xff] %v2283_v24 }
 0x28b   :  { %v2285_v25 = vpop.eup %2284 }
 0x28c   :  { %v2287_v26 = vpop.eup %2286  ;;  %1567 = vst [vmem:[#allocation2 + $0xf8] sm:$0xff] %v2285_v25 }
 0x28d   :  { %1565 = vst [vmem:[#allocation2 + $0xe8] sm:$0xff] %v2287_v26 }
 0x28e   :  { %2299 = shalt.err (!%p2296_p4)
}
 0x28f   :  { %s2300_s11 = scalar_lea.hbm %s2744_s5, 4096 }
 0x290   :  { %p2301_p5 = scmp.ne.s32.totalorder %s2744_s5, %s2300_s11  ;;  %p2304_p6 = scmp.lt.u32.totalorder %s2300_s11, %s2744_s5 }
 0x292   :  { %p2306_p7 = pnand %p2304_p6, %p2301_p5 }
 0x294   :  { %2309 = shalt.err (!%p2306_p7)
}
 0x295   :  { %s2314_s16 = smov 128   ;;  %s2315_s17 = smov 8  }
 0x296   :  { %1579 = dma.vmem_to_hbm [thread:$0]  %s1574_s7, 4096, %s2744_s5, [#allocation3], %s2314_s16, %s2314_s16, %s2315_s17  }
 0x297   :  { %2310 = dma.done.wait [#allocation3], 4096  }
 0x298   :  { %2311 = vsyncadd [#allocation3], 4294963200 }
 0x299   :  { %1583 = vsyncpa [#allocation3], 1 }

</bundles_post_ra>
